<compile_context>
chip_gen: v7x
topology: tpu7x:2x2x1
jax: 0.10.0
libtpu: 0.0.40
codegen_flags: <defaults>
</compile_context>

<pallas_src>
import functools

import jax
import jax.numpy as jnp
from jax.experimental import pallas as pl
from jax.experimental.pallas import tpu as pltpu

_BN_EPS = 1e-5


# ---------------------------------------------------------------------------
# Kernel 1: fused conv (tap gather + MXU GEMM) + per-image BN partial stats
# ---------------------------------------------------------------------------
def _conv_bn_stats_kernel(x_ref, w_ref, z_ref, sum_ref, ssq_ref, *,
                          taps, Ho, Wo):
    # x_ref : (P, Hq, Wq, Cin)   padded input plane(s) of one batch element
    # w_ref : (T, Cin, Cout)     VMEM-resident tap weights
    # z_ref : (1, Ho*Wo, Cout)   conv output (compute dtype, e.g. bf16)
    # sum_ref / ssq_ref : (1, 1, Cout) f32 per-image BN partial statistics
    plane_cache = {}
    acc = None
    for t, (p, ro, co) in enumerate(taps):
        if p not in plane_cache:
            plane_cache[p] = x_ref[p]                       # (Hq, Wq, Cin)
        tap = plane_cache[p][ro:ro + Ho, co:co + Wo, :]     # (Ho, Wo, Cin)
        tap = tap.reshape(Ho * Wo, tap.shape[-1])
        part = jnp.dot(tap, w_ref[t], preferred_element_type=jnp.float32)
        acc = part if acc is None else acc + part
    z_ref[...] = acc[None].astype(z_ref.dtype)
    # Stats from the f32 accumulator, before the (possibly bf16) cast.
    sum_ref[...] = jnp.sum(acc, axis=0, keepdims=True)[None]
    ssq_ref[...] = jnp.sum(acc * acc, axis=0, keepdims=True)[None]


def _conv_stats(planes, wtaps, *, taps, Ho, Wo):
    """planes: (B, P, Hq, Wq, Cin); wtaps: (T, Cin, Cout)."""
    B, P, Hq, Wq, Cin = planes.shape
    T, _, Cout = wtaps.shape
    Mo = Ho * Wo
    flat = planes.reshape(B * P, Hq, Wq, Cin)
    kernel = functools.partial(_conv_bn_stats_kernel, taps=taps, Ho=Ho, Wo=Wo)
    return pl.pallas_call(
        kernel,
        out_shape=(
            jax.ShapeDtypeStruct((B, Mo, Cout), planes.dtype),   # z
            jax.ShapeDtypeStruct((B, 1, Cout), jnp.float32),     # sum
            jax.ShapeDtypeStruct((B, 1, Cout), jnp.float32),     # sum of sq
        ),
        grid_spec=pltpu.PrefetchScalarGridSpec(
            num_scalar_prefetch=0,
            grid=(B,),
            in_specs=[
                pl.BlockSpec((P, Hq, Wq, Cin), lambda b: (b, 0, 0, 0)),
                # Weights: constant block index -> resident in VMEM.
                pl.BlockSpec((T, Cin, Cout), lambda b: (0, 0, 0)),
            ],
            out_specs=(
                pl.BlockSpec((1, Mo, Cout), lambda b: (b, 0, 0)),
                pl.BlockSpec((1, 1, Cout), lambda b: (b, 0, 0)),
                pl.BlockSpec((1, 1, Cout), lambda b: (b, 0, 0)),
            ),
        ),
        compiler_params=pltpu.CompilerParams(
            dimension_semantics=("parallel",)),
    )(flat, wtaps)


# ---------------------------------------------------------------------------
# Kernel 2: BN apply (folded scale/shift) + optional fused residual + ReLU
#   res_mode: 0 = none, 1 = identity residual, 2 = projection residual
# ---------------------------------------------------------------------------
def _bn_apply_kernel(relu, res_mode, *refs):
    if res_mode == 0:
        z_ref, a_ref, b_ref, o_ref = refs
    elif res_mode == 1:
        z_ref, a_ref, b_ref, r_ref, o_ref = refs
    else:
        z_ref, a_ref, b_ref, r_ref, ra_ref, rb_ref, o_ref = refs
    # f32 elementwise math; narrow only at the final store.
    y = z_ref[...].astype(jnp.float32) * a_ref[...] + b_ref[...]
    if res_mode == 1:
        y = y + r_ref[...].astype(jnp.float32)
    elif res_mode == 2:
        y = y + (r_ref[...].astype(jnp.float32) * ra_ref[...] + rb_ref[...])
    if relu:
        y = jnp.maximum(y, 0.0)
    o_ref[...] = y.astype(o_ref.dtype)


def _bn_apply(z, a, b, residual=None, res_a=None, res_b=None, *,
              relu, out_dtype):
    B, Mo, C = z.shape
    row = pl.BlockSpec((1, Mo, C), lambda i: (i, 0, 0))
    vec = pl.BlockSpec((1, C), lambda i: (0, 0))
    if residual is None:
        mode, inputs, specs = 0, [z, a, b], [row, vec, vec]
    elif res_a is None:
        mode, inputs, specs = 1, [z, a, b, residual], [row, vec, vec, row]
    else:
        mode = 2
        inputs = [z, a, b, residual, res_a, res_b]
        specs = [row, vec, vec, row, vec, vec]
    return pl.pallas_call(
        functools.partial(_bn_apply_kernel, relu, mode),
        out_shape=jax.ShapeDtypeStruct((B, Mo, C), out_dtype),
        grid_spec=pltpu.PrefetchScalarGridSpec(
            num_scalar_prefetch=0,
            grid=(B,),
            in_specs=specs,
            out_specs=row,
        ),
        compiler_params=pltpu.CompilerParams(
            dimension_semantics=("parallel",)),
    )(*inputs)


# ---------------------------------------------------------------------------
# Host-side glue: BN fold, weight re-layout, block wiring
# ---------------------------------------------------------------------------
def _fold_bn(psum, pssq, gamma, beta, count):
    """Cross-image reduction of partial stats; returns a, b with BN(z)=z*a+b."""
    s = jnp.sum(psum[:, 0, :], axis=0)
    ss = jnp.sum(pssq[:, 0, :], axis=0)
    mean = s / count
    var = jnp.maximum(ss / count - mean * mean, 0.0)
    a = gamma.astype(jnp.float32) * jax.lax.rsqrt(var + _BN_EPS)
    b = beta.astype(jnp.float32) - a * mean
    return a[None], b[None]                                  # (1, C) each


def _w_to_taps(w_oihw, dtype):
    # (O, I, kH, kW) -> (kH*kW, I, O), tap t = ky*kW + kx
    O, I, kH, kW = w_oihw.shape
    return jnp.transpose(w_oihw, (2, 3, 1, 0)).reshape(kH * kW, I, O).astype(dtype)


@functools.partial(jax.jit, static_argnames=("stride", "compute_dtype"))
def residual_block(x_nchw, params, stride, compute_dtype=jnp.bfloat16):
    assert stride in (1, 2)
    x = jnp.transpose(x_nchw, (0, 2, 3, 1)).astype(jnp.float32)   # NCHW->NHWC
    B, H, W, Cin = x.shape
    Cout = params["w1"].shape[0]
    Ho, Wo = H // stride, W // stride
    Mo = Ho * Wo
    xc = x.astype(compute_dtype)

    # Spatially padded input; for stride 2 split into 4 parity planes so every
    # conv tap becomes a unit-stride in-kernel slice.
    xp = jnp.pad(xc, ((0, 0), (1, 1), (1, 1), (0, 0)))
    if stride == 2:
        planes = jnp.stack(
            [xp[:, pr::2, pc::2, :] for pr in (0, 1) for pc in (0, 1)], axis=1)
        taps3 = tuple(((ky % 2) * 2 + (kx % 2), ky // 2, kx // 2)
                      for ky in range(3) for kx in range(3))
    else:
        planes = xp[:, None]
        taps3 = tuple((0, ky, kx) for ky in range(3) for kx in range(3))

    # ---- main path: conv3x3(stride) + BN + ReLU ----
    w1 = _w_to_taps(params["w1"], compute_dtype)
    z1, s1, q1 = _conv_stats(planes, w1, taps=taps3, Ho=Ho, Wo=Wo)
    a1, b1 = _fold_bn(s1, q1, params["g1"], params["b1"], B * Mo)
    y1 = _bn_apply(z1, a1, b1, relu=True, out_dtype=compute_dtype)

    # ---- main path: conv3x3(1) + BN (apply fused with the skip below) ----
    y1p = jnp.pad(y1.reshape(B, Ho, Wo, Cout),
                  ((0, 0), (1, 1), (1, 1), (0, 0)))[:, None]
    taps_s1 = tuple((0, ky, kx) for ky in range(3) for kx in range(3))
    w2 = _w_to_taps(params["w2"], compute_dtype)
    z2, s2, q2 = _conv_stats(y1p, w2, taps=taps_s1, Ho=Ho, Wo=Wo)
    a2, b2 = _fold_bn(s2, q2, params["g2"], params["b2"], B * Mo)

    # ---- skip path + fused BN2 + residual add + ReLU ----
    if stride == 2:
        # 1x1 / stride-2 / pad-0 projection == the (odd, odd) parity plane.
        ws = _w_to_taps(params["ws"], compute_dtype)
        zs, ss, qs = _conv_stats(planes, ws, taps=((3, 0, 0),), Ho=Ho, Wo=Wo)
        sa, sb = _fold_bn(ss, qs, params["gs"], params["bs"], B * Mo)
        out = _bn_apply(z2, a2, b2, residual=zs, res_a=sa, res_b=sb,
                        relu=True, out_dtype=jnp.float32)
    else:
        assert Cin == Cout
        # Identity skip: read x directly (no padded/materialized copy).
        out = _bn_apply(z2, a2, b2, residual=xc.reshape(B, Mo, Cin),
                        relu=True, out_dtype=jnp.float32)

    out = out.reshape(B, Ho, Wo, Cout)
    return jnp.transpose(out, (0, 3, 1, 2))                  # NHWC -> NCHW


# ---------------------------------------------------------------------------
# Pure-JAX f32 reference (lax.conv) for correctness checking
# ---------------------------------------------------------------------------
def _ref_block(x, params, stride):
    def conv(x, w, s, pad):
        return jax.lax.conv_general_dilated(
            x, w, (s, s), ((pad, pad), (pad, pad)),
            dimension_numbers=("NCHW", "OIHW", "NCHW"),
            precision=jax.lax.Precision.HIGHEST)

    def bn(x, g, b):
        mean = jnp.mean(x, axis=(0, 2, 3), keepdims=True)
        var = jnp.mean((x - mean) ** 2, axis=(0, 2, 3), keepdims=True)
        return (g.reshape(1, -1, 1, 1) * (x - mean) / jnp.sqrt(var + _BN_EPS)
                + b.reshape(1, -1, 1, 1))

    m = jnp.maximum(bn(conv(x, params["w1"], stride, 1),
                       params["g1"], params["b1"]), 0.0)
    m = bn(conv(m, params["w2"], 1, 1), params["g2"], params["b2"])
    if stride == 2:
        s = bn(conv(x, params["ws"], 2, 0), params["gs"], params["bs"])
    else:
        s = x
    return jnp.maximum(m + s, 0.0)


def _make_params(key, cin, cout, stride):
    ks = jax.random.split(key, 9)
    p = {
        "w1": 0.1 * jax.random.normal(ks[0], (cout, cin, 3, 3), jnp.float32),
        "g1": 1.0 + 0.1 * jax.random.normal(ks[1], (cout,), jnp.float32),
        "b1": 0.1 * jax.random.normal(ks[2], (cout,), jnp.float32),
        "w2": 0.1 * jax.random.normal(ks[3], (cout, cout, 3, 3), jnp.float32),
        "g2": 1.0 + 0.1 * jax.random.normal(ks[4], (cout,), jnp.float32),
        "b2": 0.1 * jax.random.normal(ks[5], (cout,), jnp.float32),
    }
    if stride == 2:
        p["ws"] = 0.1 * jax.random.normal(ks[6], (cout, cin, 1, 1), jnp.float32)
        p["gs"] = 1.0 + 0.1 * jax.random.normal(ks[7], (cout,), jnp.float32)
        p["bs"] = 0.1 * jax.random.normal(ks[8], (cout,), jnp.float32)
    return p


if __name__ == "__main__":
    key = jax.random.PRNGKey(0)
    kx1, kp1, kx2, kp2 = jax.random.split(key, 4)

    cases = []
    # Case 1: downsampling block (stride=2, 1x1 projection skip)
    x1 = jax.random.normal(kx1, (2, 4, 16, 16), jnp.float32)
    cases.append((x1, _make_params(kp1, 4, 8, stride=2), 2, (2, 8, 8, 8)))
    # Case 2: identity-skip block (stride=1, in==out channels)
    x2 = jax.random.normal(kx2, (2, 8, 16, 16), jnp.float32)
    cases.append((x2, _make_params(kp2, 8, 8, stride=1), 1, (2, 8, 16, 16)))

    for x, params, stride, out_shape in cases:
        ref = _ref_block(x, params, stride)

        # f32 compute path: tighter bar (catches layout / tap-indexing bugs).
        out = jax.block_until_ready(
            residual_block(x, params, stride, compute_dtype=jnp.float32))
        assert out.shape == out_shape
        err = jnp.abs(out - ref)
        assert bool(jnp.all(err <= 2e-2 + 2e-2 * jnp.abs(ref))), float(jnp.max(err))
        assert float(jnp.mean(err)) < 1e-2

        # bf16 compute path (production config): bf16-appropriate tolerance.
        out = jax.block_until_ready(
            residual_block(x, params, stride, compute_dtype=jnp.bfloat16))
        assert out.shape == out_shape
        err = jnp.abs(out - ref)
        assert bool(jnp.all(err <= 1e-1 + 6e-2 * jnp.abs(ref))), float(jnp.max(err))
        assert float(jnp.mean(err)) < 2e-2

    print("KERNEL_OK")
</pallas_src>

<mosaic_0001>
module attributes {stable_mosaic.version = 11 : i64} {
  func.func @_conv_bn_stats_kernel(%arg0: i32, %arg1: memref<4x9x9x4xf32, #tpu.memory_space<vmem>>, %arg2: memref<9x4x8xf32, #tpu.memory_space<vmem>>, %arg3: memref<1x64x8xf32, #tpu.memory_space<vmem>>, %arg4: memref<1x1x8xf32, #tpu.memory_space<vmem>>, %arg5: memref<1x1x8xf32, #tpu.memory_space<vmem>>) attributes {dimension_semantics = [#tpu.dimension_semantics<parallel>], iteration_bounds = array<i64: 2>, scalar_prefetch = 0 : i64, scratch_operands = 0 : i64, tpu.core_type = #tpu.core_type<tc>, window_params = [{transform_indices = @transform_0, window_bounds = array<i64: 4, 9, 9, 4>}, {pipeline_mode = #tpu.pipeline_mode<synchronous>, transform_indices = @transform_1, window_bounds = array<i64: 9, 4, 8>}, {transform_indices = @transform_2, window_bounds = array<i64: 1, 64, 8>}, {transform_indices = @transform_3, window_bounds = array<i64: 1, 1, 8>}, {transform_indices = @transform_4, window_bounds = array<i64: 1, 1, 8>}]} {
    %c0 = arith.constant 0 : index
    %c0_0 = arith.constant 0 : index
    %c0_1 = arith.constant 0 : index
    %c0_2 = arith.constant 0 : index
    %0 = vector.load %arg1[%c0, %c0_0, %c0_1, %c0_2] : memref<4x9x9x4xf32, #tpu.memory_space<vmem>>, vector<1x9x9x4xf32>
    %1 = vector.shape_cast %0 : vector<1x9x9x4xf32> to vector<9x9x4xf32>
    %2 = vector.extract_strided_slice %1 {offsets = [0, 0, 0], sizes = [8, 8, 4], strides = [1, 1, 1]} : vector<9x9x4xf32> to vector<8x8x4xf32>
    %3 = vector.shape_cast %2 : vector<8x8x4xf32> to vector<64x4xf32>
    %c0_3 = arith.constant 0 : index
    %c0_4 = arith.constant 0 : index
    %c0_5 = arith.constant 0 : index
    %4 = vector.load %arg2[%c0_3, %c0_4, %c0_5] : memref<9x4x8xf32, #tpu.memory_space<vmem>>, vector<1x4x8xf32>
    %5 = vector.shape_cast %4 : vector<1x4x8xf32> to vector<4x8xf32>
    %cst = arith.constant dense<0.000000e+00> : vector<64x8xf32>
    %6 = tpu.matmul %3, %5, %cst {dimension_numbers = #tpu.dot_dimension_numbers<[1], [0], [0], [1], [0, 0, 1, 1], [], []>} : vector<64x4xf32>, vector<4x8xf32>, vector<64x8xf32> -> vector<64x8xf32>
    %c1 = arith.constant 1 : index
    %c0_6 = arith.constant 0 : index
    %c0_7 = arith.constant 0 : index
    %c0_8 = arith.constant 0 : index
    %7 = vector.load %arg1[%c1, %c0_6, %c0_7, %c0_8] : memref<4x9x9x4xf32, #tpu.memory_space<vmem>>, vector<1x9x9x4xf32>
    %8 = vector.shape_cast %7 : vector<1x9x9x4xf32> to vector<9x9x4xf32>
    %9 = vector.extract_strided_slice %8 {offsets = [0, 0, 0], sizes = [8, 8, 4], strides = [1, 1, 1]} : vector<9x9x4xf32> to vector<8x8x4xf32>
    %10 = vector.shape_cast %9 : vector<8x8x4xf32> to vector<64x4xf32>
    %c1_9 = arith.constant 1 : index
    %c0_10 = arith.constant 0 : index
    %c0_11 = arith.constant 0 : index
    %11 = vector.load %arg2[%c1_9, %c0_10, %c0_11] : memref<9x4x8xf32, #tpu.memory_space<vmem>>, vector<1x4x8xf32>
    %12 = vector.shape_cast %11 : vector<1x4x8xf32> to vector<4x8xf32>
    %cst_12 = arith.constant dense<0.000000e+00> : vector<64x8xf32>
    %13 = tpu.matmul %10, %12, %cst_12 {dimension_numbers = #tpu.dot_dimension_numbers<[1], [0], [0], [1], [0, 0, 1, 1], [], []>} : vector<64x4xf32>, vector<4x8xf32>, vector<64x8xf32> -> vector<64x8xf32>
    %14 = arith.addf %6, %13 : vector<64x8xf32>
    %15 = vector.extract_strided_slice %1 {offsets = [0, 1, 0], sizes = [8, 8, 4], strides = [1, 1, 1]} : vector<9x9x4xf32> to vector<8x8x4xf32>
    %16 = vector.shape_cast %15 : vector<8x8x4xf32> to vector<64x4xf32>
    %c2 = arith.constant 2 : index
    %c0_13 = arith.constant 0 : index
    %c0_14 = arith.constant 0 : index
    %17 = vector.load %arg2[%c2, %c0_13, %c0_14] : memref<9x4x8xf32, #tpu.memory_space<vmem>>, vector<1x4x8xf32>
    %18 = vector.shape_cast %17 : vector<1x4x8xf32> to vector<4x8xf32>
    %cst_15 = arith.constant dense<0.000000e+00> : vector<64x8xf32>
    %19 = tpu.matmul %16, %18, %cst_15 {dimension_numbers = #tpu.dot_dimension_numbers<[1], [0], [0], [1], [0, 0, 1, 1], [], []>} : vector<64x4xf32>, vector<4x8xf32>, vector<64x8xf32> -> vector<64x8xf32>
    %20 = arith.addf %14, %19 : vector<64x8xf32>
    %c2_16 = arith.constant 2 : index
    %c0_17 = arith.constant 0 : index
    %c0_18 = arith.constant 0 : index
    %c0_19 = arith.constant 0 : index
    %21 = vector.load %arg1[%c2_16, %c0_17, %c0_18, %c0_19] : memref<4x9x9x4xf32, #tpu.memory_space<vmem>>, vector<1x9x9x4xf32>
    %22 = vector.shape_cast %21 : vector<1x9x9x4xf32> to vector<9x9x4xf32>
    %23 = vector.extract_strided_slice %22 {offsets = [0, 0, 0], sizes = [8, 8, 4], strides = [1, 1, 1]} : vector<9x9x4xf32> to vector<8x8x4xf32>
    %24 = vector.shape_cast %23 : vector<8x8x4xf32> to vector<64x4xf32>
    %c3 = arith.constant 3 : index
    %c0_20 = arith.constant 0 : index
    %c0_21 = arith.constant 0 : index
    %25 = vector.load %arg2[%c3, %c0_20, %c0_21] : memref<9x4x8xf32, #tpu.memory_space<vmem>>, vector<1x4x8xf32>
    %26 = vector.shape_cast %25 : vector<1x4x8xf32> to vector<4x8xf32>
    %cst_22 = arith.constant dense<0.000000e+00> : vector<64x8xf32>
    %27 = tpu.matmul %24, %26, %cst_22 {dimension_numbers = #tpu.dot_dimension_numbers<[1], [0], [0], [1], [0, 0, 1, 1], [], []>} : vector<64x4xf32>, vector<4x8xf32>, vector<64x8xf32> -> vector<64x8xf32>
    %28 = arith.addf %20, %27 : vector<64x8xf32>
    %c3_23 = arith.constant 3 : index
    %c0_24 = arith.constant 0 : index
    %c0_25 = arith.constant 0 : index
    %c0_26 = arith.constant 0 : index
    %29 = vector.load %arg1[%c3_23, %c0_24, %c0_25, %c0_26] : memref<4x9x9x4xf32, #tpu.memory_space<vmem>>, vector<1x9x9x4xf32>
    %30 = vector.shape_cast %29 : vector<1x9x9x4xf32> to vector<9x9x4xf32>
    %31 = vector.extract_strided_slice %30 {offsets = [0, 0, 0], sizes = [8, 8, 4], strides = [1, 1, 1]} : vector<9x9x4xf32> to vector<8x8x4xf32>
    %32 = vector.shape_cast %31 : vector<8x8x4xf32> to vector<64x4xf32>
    %c4 = arith.constant 4 : index
    %c0_27 = arith.constant 0 : index
    %c0_28 = arith.constant 0 : index
    %33 = vector.load %arg2[%c4, %c0_27, %c0_28] : memref<9x4x8xf32, #tpu.memory_space<vmem>>, vector<1x4x8xf32>
    %34 = vector.shape_cast %33 : vector<1x4x8xf32> to vector<4x8xf32>
    %cst_29 = arith.constant dense<0.000000e+00> : vector<64x8xf32>
    %35 = tpu.matmul %32, %34, %cst_29 {dimension_numbers = #tpu.dot_dimension_numbers<[1], [0], [0], [1], [0, 0, 1, 1], [], []>} : vector<64x4xf32>, vector<4x8xf32>, vector<64x8xf32> -> vector<64x8xf32>
    %36 = arith.addf %28, %35 : vector<64x8xf32>
    %37 = vector.extract_strided_slice %22 {offsets = [0, 1, 0], sizes = [8, 8, 4], strides = [1, 1, 1]} : vector<9x9x4xf32> to vector<8x8x4xf32>
    %38 = vector.shape_cast %37 : vector<8x8x4xf32> to vector<64x4xf32>
    %c5 = arith.constant 5 : index
    %c0_30 = arith.constant 0 : index
    %c0_31 = arith.constant 0 : index
    %39 = vector.load %arg2[%c5, %c0_30, %c0_31] : memref<9x4x8xf32, #tpu.memory_space<vmem>>, vector<1x4x8xf32>
    %40 = vector.shape_cast %39 : vector<1x4x8xf32> to vector<4x8xf32>
    %cst_32 = arith.constant dense<0.000000e+00> : vector<64x8xf32>
    %41 = tpu.matmul %38, %40, %cst_32 {dimension_numbers = #tpu.dot_dimension_numbers<[1], [0], [0], [1], [0, 0, 1, 1], [], []>} : vector<64x4xf32>, vector<4x8xf32>, vector<64x8xf32> -> vector<64x8xf32>
    %42 = arith.addf %36, %41 : vector<64x8xf32>
    %43 = vector.extract_strided_slice %1 {offsets = [1, 0, 0], sizes = [8, 8, 4], strides = [1, 1, 1]} : vector<9x9x4xf32> to vector<8x8x4xf32>
    %44 = vector.shape_cast %43 : vector<8x8x4xf32> to vector<64x4xf32>
    %c6 = arith.constant 6 : index
    %c0_33 = arith.constant 0 : index
    %c0_34 = arith.constant 0 : index
    %45 = vector.load %arg2[%c6, %c0_33, %c0_34] : memref<9x4x8xf32, #tpu.memory_space<vmem>>, vector<1x4x8xf32>
    %46 = vector.shape_cast %45 : vector<1x4x8xf32> to vector<4x8xf32>
    %cst_35 = arith.constant dense<0.000000e+00> : vector<64x8xf32>
    %47 = tpu.matmul %44, %46, %cst_35 {dimension_numbers = #tpu.dot_dimension_numbers<[1], [0], [0], [1], [0, 0, 1, 1], [], []>} : vector<64x4xf32>, vector<4x8xf32>, vector<64x8xf32> -> vector<64x8xf32>
    %48 = arith.addf %42, %47 : vector<64x8xf32>
    %49 = vector.extract_strided_slice %8 {offsets = [1, 0, 0], sizes = [8, 8, 4], strides = [1, 1, 1]} : vector<9x9x4xf32> to vector<8x8x4xf32>
    %50 = vector.shape_cast %49 : vector<8x8x4xf32> to vector<64x4xf32>
    %c7 = arith.constant 7 : index
    %c0_36 = arith.constant 0 : index
    %c0_37 = arith.constant 0 : index
    %51 = vector.load %arg2[%c7, %c0_36, %c0_37] : memref<9x4x8xf32, #tpu.memory_space<vmem>>, vector<1x4x8xf32>
    %52 = vector.shape_cast %51 : vector<1x4x8xf32> to vector<4x8xf32>
    %cst_38 = arith.constant dense<0.000000e+00> : vector<64x8xf32>
    %53 = tpu.matmul %50, %52, %cst_38 {dimension_numbers = #tpu.dot_dimension_numbers<[1], [0], [0], [1], [0, 0, 1, 1], [], []>} : vector<64x4xf32>, vector<4x8xf32>, vector<64x8xf32> -> vector<64x8xf32>
    %54 = arith.addf %48, %53 : vector<64x8xf32>
    %55 = vector.extract_strided_slice %1 {offsets = [1, 1, 0], sizes = [8, 8, 4], strides = [1, 1, 1]} : vector<9x9x4xf32> to vector<8x8x4xf32>
    %56 = vector.shape_cast %55 : vector<8x8x4xf32> to vector<64x4xf32>
    %c8 = arith.constant 8 : index
    %c0_39 = arith.constant 0 : index
    %c0_40 = arith.constant 0 : index
    %57 = vector.load %arg2[%c8, %c0_39, %c0_40] : memref<9x4x8xf32, #tpu.memory_space<vmem>>, vector<1x4x8xf32>
    %58 = vector.shape_cast %57 : vector<1x4x8xf32> to vector<4x8xf32>
    %cst_41 = arith.constant dense<0.000000e+00> : vector<64x8xf32>
    %59 = tpu.matmul %56, %58, %cst_41 {dimension_numbers = #tpu.dot_dimension_numbers<[1], [0], [0], [1], [0, 0, 1, 1], [], []>} : vector<64x4xf32>, vector<4x8xf32>, vector<64x8xf32> -> vector<64x8xf32>
    %60 = arith.addf %54, %59 : vector<64x8xf32>
    %61 = vector.shape_cast %60 : vector<64x8xf32> to vector<1x64x8xf32>
    %c0_42 = arith.constant 0 : index
    %c0_43 = arith.constant 0 : index
    %c0_44 = arith.constant 0 : index
    %62 = vector.load %arg3[%c0_42, %c0_43, %c0_44] : memref<1x64x8xf32, #tpu.memory_space<vmem>>, vector<1x64x8xf32>
    tpu.vector_store %arg3[%c0_42, %c0_43, %c0_44], %61 {strides = array<i32>} : memref<1x64x8xf32, #tpu.memory_space<vmem>>, vector<1x64x8xf32>,
    %cst_45 = arith.constant dense<0.000000e+00> : vector<8xf32>
    %63 = vector.multi_reduction <add>, %60, %cst_45 [0] : vector<64x8xf32> to vector<8xf32>
    %64 = vector.shape_cast %63 : vector<8xf32> to vector<1x8xf32>
    %65 = vector.shape_cast %64 : vector<1x8xf32> to vector<1x1x8xf32>
    %c0_46 = arith.constant 0 : index
    %c0_47 = arith.constant 0 : index
    %c0_48 = arith.constant 0 : index
    %66 = vector.load %arg4[%c0_46, %c0_47, %c0_48] : memref<1x1x8xf32, #tpu.memory_space<vmem>>, vector<1x1x8xf32>
    tpu.vector_store %arg4[%c0_46, %c0_47, %c0_48], %65 {strides = array<i32>} : memref<1x1x8xf32, #tpu.memory_space<vmem>>, vector<1x1x8xf32>,
    %67 = arith.mulf %60, %60 : vector<64x8xf32>
    %cst_49 = arith.constant dense<0.000000e+00> : vector<8xf32>
    %68 = vector.multi_reduction <add>, %67, %cst_49 [0] : vector<64x8xf32> to vector<8xf32>
    %69 = vector.shape_cast %68 : vector<8xf32> to vector<1x8xf32>
    %70 = vector.shape_cast %69 : vector<1x8xf32> to vector<1x1x8xf32>
    %c0_50 = arith.constant 0 : index
    %c0_51 = arith.constant 0 : index
    %c0_52 = arith.constant 0 : index
    %71 = vector.load %arg5[%c0_50, %c0_51, %c0_52] : memref<1x1x8xf32, #tpu.memory_space<vmem>>, vector<1x1x8xf32>
    tpu.vector_store %arg5[%c0_50, %c0_51, %c0_52], %70 {strides = array<i32>} : memref<1x1x8xf32, #tpu.memory_space<vmem>>, vector<1x1x8xf32>,
    return
  }
  func.func @transform_0(%arg0: i32) -> (i32, i32, i32, i32) {
    %c0_i32 = arith.constant 0 : i32
    %c0_i32_0 = arith.constant 0 : i32
    %c0_i32_1 = arith.constant 0 : i32
    %c0_i32_2 = arith.constant 0 : i32
    return %arg0, %c0_i32, %c0_i32_0, %c0_i32_1 : i32, i32, i32, i32
  }
  func.func @transform_1(%arg0: i32) -> (i32, i32, i32) {
    %c0_i32 = arith.constant 0 : i32
    %c0_i32_0 = arith.constant 0 : i32
    %c0_i32_1 = arith.constant 0 : i32
    %c0_i32_2 = arith.constant 0 : i32
    return %c0_i32, %c0_i32_0, %c0_i32_1 : i32, i32, i32
  }
  func.func @transform_2(%arg0: i32) -> (i32, i32, i32) {
    %c0_i32 = arith.constant 0 : i32
    %c0_i32_0 = arith.constant 0 : i32
    %c0_i32_1 = arith.constant 0 : i32
    return %arg0, %c0_i32, %c0_i32_0 : i32, i32, i32
  }
  func.func @transform_3(%arg0: i32) -> (i32, i32, i32) {
    %c0_i32 = arith.constant 0 : i32
    %c0_i32_0 = arith.constant 0 : i32
    %c0_i32_1 = arith.constant 0 : i32
    return %arg0, %c0_i32, %c0_i32_0 : i32, i32, i32
  }
  func.func @transform_4(%arg0: i32) -> (i32, i32, i32) {
    %c0_i32 = arith.constant 0 : i32
    %c0_i32_0 = arith.constant 0 : i32
    %c0_i32_1 = arith.constant 0 : i32
    return %arg0, %c0_i32, %c0_i32_0 : i32, i32, i32
  }
}

module attributes {stable_mosaic.version = 11 : i64} {
  func.func @_bn_apply_kernel(%arg0: i32, %arg1: memref<1x64x8xf32, #tpu.memory_space<vmem>>, %arg2: memref<1x8xf32, #tpu.memory_space<vmem>>, %arg3: memref<1x8xf32, #tpu.memory_space<vmem>>, %arg4: memref<1x64x8xf32, #tpu.memory_space<vmem>>) attributes {dimension_semantics = [#tpu.dimension_semantics<parallel>], iteration_bounds = array<i64: 2>, scalar_prefetch = 0 : i64, scratch_operands = 0 : i64, tpu.core_type = #tpu.core_type<tc>, window_params = [{transform_indices = @transform_0, window_bounds = array<i64: 1, 64, 8>}, {pipeline_mode = #tpu.pipeline_mode<synchronous>, transform_indices = @transform_1, window_bounds = array<i64: 1, 8>}, {pipeline_mode = #tpu.pipeline_mode<synchronous>, transform_indices = @transform_2, window_bounds = array<i64: 1, 8>}, {transform_indices = @transform_3, window_bounds = array<i64: 1, 64, 8>}]} {
    %c0 = arith.constant 0 : index
    %c0_0 = arith.constant 0 : index
    %c0_1 = arith.constant 0 : index
    %0 = vector.load %arg1[%c0, %c0_0, %c0_1] : memref<1x64x8xf32, #tpu.memory_space<vmem>>, vector<1x64x8xf32>
    %c0_2 = arith.constant 0 : index
    %c0_3 = arith.constant 0 : index
    %1 = vector.load %arg2[%c0_2, %c0_3] : memref<1x8xf32, #tpu.memory_space<vmem>>, vector<1x8xf32>
    %2 = vector.shape_cast %1 : vector<1x8xf32> to vector<1x1x8xf32>
    %3 = vector.broadcast %2 : vector<1x1x8xf32> to vector<1x64x8xf32>
    %4 = arith.mulf %0, %3 : vector<1x64x8xf32>
    %c0_4 = arith.constant 0 : index
    %c0_5 = arith.constant 0 : index
    %5 = vector.load %arg3[%c0_4, %c0_5] : memref<1x8xf32, #tpu.memory_space<vmem>>, vector<1x8xf32>
    %6 = vector.shape_cast %5 : vector<1x8xf32> to vector<1x1x8xf32>
    %7 = vector.broadcast %6 : vector<1x1x8xf32> to vector<1x64x8xf32>
    %8 = arith.addf %4, %7 : vector<1x64x8xf32>
    %cst = arith.constant 0.000000e+00 : f32
    %9 = vector.broadcast %cst : f32 to vector<1x64x8xf32>
    %10 = arith.maximumf %8, %9 : vector<1x64x8xf32>
    %c0_6 = arith.constant 0 : index
    %c0_7 = arith.constant 0 : index
    %c0_8 = arith.constant 0 : index
    %11 = vector.load %arg4[%c0_6, %c0_7, %c0_8] : memref<1x64x8xf32, #tpu.memory_space<vmem>>, vector<1x64x8xf32>
    tpu.vector_store %arg4[%c0_6, %c0_7, %c0_8], %10 {strides = array<i32>} : memref<1x64x8xf32, #tpu.memory_space<vmem>>, vector<1x64x8xf32>,
    return
  }
  func.func @transform_0(%arg0: i32) -> (i32, i32, i32) {
    %c0_i32 = arith.constant 0 : i32
    %c0_i32_0 = arith.constant 0 : i32
    %c0_i32_1 = arith.constant 0 : i32
    return %arg0, %c0_i32, %c0_i32_0 : i32, i32, i32
  }
  func.func @transform_1(%arg0: i32) -> (i32, i32) {
    %c0_i32 = arith.constant 0 : i32
    %c0_i32_0 = arith.constant 0 : i32
    %c0_i32_1 = arith.constant 0 : i32
    return %c0_i32, %c0_i32_0 : i32, i32
  }
  func.func @transform_2(%arg0: i32) -> (i32, i32) {
    %c0_i32 = arith.constant 0 : i32
    %c0_i32_0 = arith.constant 0 : i32
    %c0_i32_1 = arith.constant 0 : i32
    return %c0_i32, %c0_i32_0 : i32, i32
  }
  func.func @transform_3(%arg0: i32) -> (i32, i32, i32) {
    %c0_i32 = arith.constant 0 : i32
    %c0_i32_0 = arith.constant 0 : i32
    %c0_i32_1 = arith.constant 0 : i32
    return %arg0, %c0_i32, %c0_i32_0 : i32, i32, i32
  }
}

module attributes {stable_mosaic.version = 11 : i64} {
  func.func @_conv_bn_stats_kernel(%arg0: i32, %arg1: memref<1x10x10x8xf32, #tpu.memory_space<vmem>>, %arg2: memref<9x8x8xf32, #tpu.memory_space<vmem>>, %arg3: memref<1x64x8xf32, #tpu.memory_space<vmem>>, %arg4: memref<1x1x8xf32, #tpu.memory_space<vmem>>, %arg5: memref<1x1x8xf32, #tpu.memory_space<vmem>>) attributes {dimension_semantics = [#tpu.dimension_semantics<parallel>], iteration_bounds = array<i64: 2>, scalar_prefetch = 0 : i64, scratch_operands = 0 : i64, tpu.core_type = #tpu.core_type<tc>, window_params = [{transform_indices = @transform_0, window_bounds = array<i64: 1, 10, 10, 8>}, {pipeline_mode = #tpu.pipeline_mode<synchronous>, transform_indices = @transform_1, window_bounds = array<i64: 9, 8, 8>}, {transform_indices = @transform_2, window_bounds = array<i64: 1, 64, 8>}, {transform_indices = @transform_3, window_bounds = array<i64: 1, 1, 8>}, {transform_indices = @transform_4, window_bounds = array<i64: 1, 1, 8>}]} {
    %c0 = arith.constant 0 : index
    %c0_0 = arith.constant 0 : index
    %c0_1 = arith.constant 0 : index
    %c0_2 = arith.constant 0 : index
    %0 = vector.load %arg1[%c0, %c0_0, %c0_1, %c0_2] : memref<1x10x10x8xf32, #tpu.memory_space<vmem>>, vector<1x10x10x8xf32>
    %1 = vector.shape_cast %0 : vector<1x10x10x8xf32> to vector<10x10x8xf32>
    %2 = vector.extract_strided_slice %1 {offsets = [0, 0, 0], sizes = [8, 8, 8], strides = [1, 1, 1]} : vector<10x10x8xf32> to vector<8x8x8xf32>
    %3 = vector.shape_cast %2 : vector<8x8x8xf32> to vector<64x8xf32>
    %c0_3 = arith.constant 0 : index
    %c0_4 = arith.constant 0 : index
    %c0_5 = arith.constant 0 : index
    %4 = vector.load %arg2[%c0_3, %c0_4, %c0_5] : memref<9x8x8xf32, #tpu.memory_space<vmem>>, vector<1x8x8xf32>
    %5 = vector.shape_cast %4 : vector<1x8x8xf32> to vector<8x8xf32>
    %cst = arith.constant dense<0.000000e+00> : vector<64x8xf32>
    %6 = tpu.matmul %3, %5, %cst {dimension_numbers = #tpu.dot_dimension_numbers<[1], [0], [0], [1], [0, 0, 1, 1], [], []>} : vector<64x8xf32>, vector<8x8xf32>, vector<64x8xf32> -> vector<64x8xf32>
    %7 = vector.extract_strided_slice %1 {offsets = [0, 1, 0], sizes = [8, 8, 8], strides = [1, 1, 1]} : vector<10x10x8xf32> to vector<8x8x8xf32>
    %8 = vector.shape_cast %7 : vector<8x8x8xf32> to vector<64x8xf32>
    %c1 = arith.constant 1 : index
    %c0_6 = arith.constant 0 : index
    %c0_7 = arith.constant 0 : index
    %9 = vector.load %arg2[%c1, %c0_6, %c0_7] : memref<9x8x8xf32, #tpu.memory_space<vmem>>, vector<1x8x8xf32>
    %10 = vector.shape_cast %9 : vector<1x8x8xf32> to vector<8x8xf32>
    %cst_8 = arith.constant dense<0.000000e+00> : vector<64x8xf32>
    %11 = tpu.matmul %8, %10, %cst_8 {dimension_numbers = #tpu.dot_dimension_numbers<[1], [0], [0], [1], [0, 0, 1, 1], [], []>} : vector<64x8xf32>, vector<8x8xf32>, vector<64x8xf32> -> vector<64x8xf32>
    %12 = arith.addf %6, %11 : vector<64x8xf32>
    %13 = vector.extract_strided_slice %1 {offsets = [0, 2, 0], sizes = [8, 8, 8], strides = [1, 1, 1]} : vector<10x10x8xf32> to vector<8x8x8xf32>
    %14 = vector.shape_cast %13 : vector<8x8x8xf32> to vector<64x8xf32>
    %c2 = arith.constant 2 : index
    %c0_9 = arith.constant 0 : index
    %c0_10 = arith.constant 0 : index
    %15 = vector.load %arg2[%c2, %c0_9, %c0_10] : memref<9x8x8xf32, #tpu.memory_space<vmem>>, vector<1x8x8xf32>
    %16 = vector.shape_cast %15 : vector<1x8x8xf32> to vector<8x8xf32>
    %cst_11 = arith.constant dense<0.000000e+00> : vector<64x8xf32>
    %17 = tpu.matmul %14, %16, %cst_11 {dimension_numbers = #tpu.dot_dimension_numbers<[1], [0], [0], [1], [0, 0, 1, 1], [], []>} : vector<64x8xf32>, vector<8x8xf32>, vector<64x8xf32> -> vector<64x8xf32>
    %18 = arith.addf %12, %17 : vector<64x8xf32>
    %19 = vector.extract_strided_slice %1 {offsets = [1, 0, 0], sizes = [8, 8, 8], strides = [1, 1, 1]} : vector<10x10x8xf32> to vector<8x8x8xf32>
    %20 = vector.shape_cast %19 : vector<8x8x8xf32> to vector<64x8xf32>
    %c3 = arith.constant 3 : index
    %c0_12 = arith.constant 0 : index
    %c0_13 = arith.constant 0 : index
    %21 = vector.load %arg2[%c3, %c0_12, %c0_13] : memref<9x8x8xf32, #tpu.memory_space<vmem>>, vector<1x8x8xf32>
    %22 = vector.shape_cast %21 : vector<1x8x8xf32> to vector<8x8xf32>
    %cst_14 = arith.constant dense<0.000000e+00> : vector<64x8xf32>
    %23 = tpu.matmul %20, %22, %cst_14 {dimension_numbers = #tpu.dot_dimension_numbers<[1], [0], [0], [1], [0, 0, 1, 1], [], []>} : vector<64x8xf32>, vector<8x8xf32>, vector<64x8xf32> -> vector<64x8xf32>
    %24 = arith.addf %18, %23 : vector<64x8xf32>
    %25 = vector.extract_strided_slice %1 {offsets = [1, 1, 0], sizes = [8, 8, 8], strides = [1, 1, 1]} : vector<10x10x8xf32> to vector<8x8x8xf32>
    %26 = vector.shape_cast %25 : vector<8x8x8xf32> to vector<64x8xf32>
    %c4 = arith.constant 4 : index
    %c0_15 = arith.constant 0 : index
    %c0_16 = arith.constant 0 : index
    %27 = vector.load %arg2[%c4, %c0_15, %c0_16] : memref<9x8x8xf32, #tpu.memory_space<vmem>>, vector<1x8x8xf32>
    %28 = vector.shape_cast %27 : vector<1x8x8xf32> to vector<8x8xf32>
    %cst_17 = arith.constant dense<0.000000e+00> : vector<64x8xf32>
    %29 = tpu.matmul %26, %28, %cst_17 {dimension_numbers = #tpu.dot_dimension_numbers<[1], [0], [0], [1], [0, 0, 1, 1], [], []>} : vector<64x8xf32>, vector<8x8xf32>, vector<64x8xf32> -> vector<64x8xf32>
    %30 = arith.addf %24, %29 : vector<64x8xf32>
    %31 = vector.extract_strided_slice %1 {offsets = [1, 2, 0], sizes = [8, 8, 8], strides = [1, 1, 1]} : vector<10x10x8xf32> to vector<8x8x8xf32>
    %32 = vector.shape_cast %31 : vector<8x8x8xf32> to vector<64x8xf32>
    %c5 = arith.constant 5 : index
    %c0_18 = arith.constant 0 : index
    %c0_19 = arith.constant 0 : index
    %33 = vector.load %arg2[%c5, %c0_18, %c0_19] : memref<9x8x8xf32, #tpu.memory_space<vmem>>, vector<1x8x8xf32>
    %34 = vector.shape_cast %33 : vector<1x8x8xf32> to vector<8x8xf32>
    %cst_20 = arith.constant dense<0.000000e+00> : vector<64x8xf32>
    %35 = tpu.matmul %32, %34, %cst_20 {dimension_numbers = #tpu.dot_dimension_numbers<[1], [0], [0], [1], [0, 0, 1, 1], [], []>} : vector<64x8xf32>, vector<8x8xf32>, vector<64x8xf32> -> vector<64x8xf32>
    %36 = arith.addf %30, %35 : vector<64x8xf32>
    %37 = vector.extract_strided_slice %1 {offsets = [2, 0, 0], sizes = [8, 8, 8], strides = [1, 1, 1]} : vector<10x10x8xf32> to vector<8x8x8xf32>
    %38 = vector.shape_cast %37 : vector<8x8x8xf32> to vector<64x8xf32>
    %c6 = arith.constant 6 : index
    %c0_21 = arith.constant 0 : index
    %c0_22 = arith.constant 0 : index
    %39 = vector.load %arg2[%c6, %c0_21, %c0_22] : memref<9x8x8xf32, #tpu.memory_space<vmem>>, vector<1x8x8xf32>
    %40 = vector.shape_cast %39 : vector<1x8x8xf32> to vector<8x8xf32>
    %cst_23 = arith.constant dense<0.000000e+00> : vector<64x8xf32>
    %41 = tpu.matmul %38, %40, %cst_23 {dimension_numbers = #tpu.dot_dimension_numbers<[1], [0], [0], [1], [0, 0, 1, 1], [], []>} : vector<64x8xf32>, vector<8x8xf32>, vector<64x8xf32> -> vector<64x8xf32>
    %42 = arith.addf %36, %41 : vector<64x8xf32>
    %43 = vector.extract_strided_slice %1 {offsets = [2, 1, 0], sizes = [8, 8, 8], strides = [1, 1, 1]} : vector<10x10x8xf32> to vector<8x8x8xf32>
    %44 = vector.shape_cast %43 : vector<8x8x8xf32> to vector<64x8xf32>
    %c7 = arith.constant 7 : index
    %c0_24 = arith.constant 0 : index
    %c0_25 = arith.constant 0 : index
    %45 = vector.load %arg2[%c7, %c0_24, %c0_25] : memref<9x8x8xf32, #tpu.memory_space<vmem>>, vector<1x8x8xf32>
    %46 = vector.shape_cast %45 : vector<1x8x8xf32> to vector<8x8xf32>
    %cst_26 = arith.constant dense<0.000000e+00> : vector<64x8xf32>
    %47 = tpu.matmul %44, %46, %cst_26 {dimension_numbers = #tpu.dot_dimension_numbers<[1], [0], [0], [1], [0, 0, 1, 1], [], []>} : vector<64x8xf32>, vector<8x8xf32>, vector<64x8xf32> -> vector<64x8xf32>
    %48 = arith.addf %42, %47 : vector<64x8xf32>
    %49 = vector.extract_strided_slice %1 {offsets = [2, 2, 0], sizes = [8, 8, 8], strides = [1, 1, 1]} : vector<10x10x8xf32> to vector<8x8x8xf32>
    %50 = vector.shape_cast %49 : vector<8x8x8xf32> to vector<64x8xf32>
    %c8 = arith.constant 8 : index
    %c0_27 = arith.constant 0 : index
    %c0_28 = arith.constant 0 : index
    %51 = vector.load %arg2[%c8, %c0_27, %c0_28] : memref<9x8x8xf32, #tpu.memory_space<vmem>>, vector<1x8x8xf32>
    %52 = vector.shape_cast %51 : vector<1x8x8xf32> to vector<8x8xf32>
    %cst_29 = arith.constant dense<0.000000e+00> : vector<64x8xf32>
    %53 = tpu.matmul %50, %52, %cst_29 {dimension_numbers = #tpu.dot_dimension_numbers<[1], [0], [0], [1], [0, 0, 1, 1], [], []>} : vector<64x8xf32>, vector<8x8xf32>, vector<64x8xf32> -> vector<64x8xf32>
    %54 = arith.addf %48, %53 : vector<64x8xf32>
    %55 = vector.shape_cast %54 : vector<64x8xf32> to vector<1x64x8xf32>
    %c0_30 = arith.constant 0 : index
    %c0_31 = arith.constant 0 : index
    %c0_32 = arith.constant 0 : index
    %56 = vector.load %arg3[%c0_30, %c0_31, %c0_32] : memref<1x64x8xf32, #tpu.memory_space<vmem>>, vector<1x64x8xf32>
    tpu.vector_store %arg3[%c0_30, %c0_31, %c0_32], %55 {strides = array<i32>} : memref<1x64x8xf32, #tpu.memory_space<vmem>>, vector<1x64x8xf32>,
    %cst_33 = arith.constant dense<0.000000e+00> : vector<8xf32>
    %57 = vector.multi_reduction <add>, %54, %cst_33 [0] : vector<64x8xf32> to vector<8xf32>
    %58 = vector.shape_cast %57 : vector<8xf32> to vector<1x8xf32>
    %59 = vector.shape_cast %58 : vector<1x8xf32> to vector<1x1x8xf32>
    %c0_34 = arith.constant 0 : index
    %c0_35 = arith.constant 0 : index
    %c0_36 = arith.constant 0 : index
    %60 = vector.load %arg4[%c0_34, %c0_35, %c0_36] : memref<1x1x8xf32, #tpu.memory_space<vmem>>, vector<1x1x8xf32>
    tpu.vector_store %arg4[%c0_34, %c0_35, %c0_36], %59 {strides = array<i32>} : memref<1x1x8xf32, #tpu.memory_space<vmem>>, vector<1x1x8xf32>,
    %61 = arith.mulf %54, %54 : vector<64x8xf32>
    %cst_37 = arith.constant dense<0.000000e+00> : vector<8xf32>
    %62 = vector.multi_reduction <add>, %61, %cst_37 [0] : vector<64x8xf32> to vector<8xf32>
    %63 = vector.shape_cast %62 : vector<8xf32> to vector<1x8xf32>
    %64 = vector.shape_cast %63 : vector<1x8xf32> to vector<1x1x8xf32>
    %c0_38 = arith.constant 0 : index
    %c0_39 = arith.constant 0 : index
    %c0_40 = arith.constant 0 : index
    %65 = vector.load %arg5[%c0_38, %c0_39, %c0_40] : memref<1x1x8xf32, #tpu.memory_space<vmem>>, vector<1x1x8xf32>
    tpu.vector_store %arg5[%c0_38, %c0_39, %c0_40], %64 {strides = array<i32>} : memref<1x1x8xf32, #tpu.memory_space<vmem>>, vector<1x1x8xf32>,
    return
  }
  func.func @transform_0(%arg0: i32) -> (i32, i32, i32, i32) {
    %c0_i32 = arith.constant 0 : i32
    %c0_i32_0 = arith.constant 0 : i32
    %c0_i32_1 = arith.constant 0 : i32
    %c0_i32_2 = arith.constant 0 : i32
    return %arg0, %c0_i32, %c0_i32_0, %c0_i32_1 : i32, i32, i32, i32
  }
  func.func @transform_1(%arg0: i32) -> (i32, i32, i32) {
    %c0_i32 = arith.constant 0 : i32
    %c0_i32_0 = arith.constant 0 : i32
    %c0_i32_1 = arith.constant 0 : i32
    %c0_i32_2 = arith.constant 0 : i32
    return %c0_i32, %c0_i32_0, %c0_i32_1 : i32, i32, i32
  }
  func.func @transform_2(%arg0: i32) -> (i32, i32, i32) {
    %c0_i32 = arith.constant 0 : i32
    %c0_i32_0 = arith.constant 0 : i32
    %c0_i32_1 = arith.constant 0 : i32
    return %arg0, %c0_i32, %c0_i32_0 : i32, i32, i32
  }
  func.func @transform_3(%arg0: i32) -> (i32, i32, i32) {
    %c0_i32 = arith.constant 0 : i32
    %c0_i32_0 = arith.constant 0 : i32
    %c0_i32_1 = arith.constant 0 : i32
    return %arg0, %c0_i32, %c0_i32_0 : i32, i32, i32
  }
  func.func @transform_4(%arg0: i32) -> (i32, i32, i32) {
    %c0_i32 = arith.constant 0 : i32
    %c0_i32_0 = arith.constant 0 : i32
    %c0_i32_1 = arith.constant 0 : i32
    return %arg0, %c0_i32, %c0_i32_0 : i32, i32, i32
  }
}

module attributes {stable_mosaic.version = 11 : i64} {
  func.func @_conv_bn_stats_kernel(%arg0: i32, %arg1: memref<4x9x9x4xf32, #tpu.memory_space<vmem>>, %arg2: memref<1x4x8xf32, #tpu.memory_space<vmem>>, %arg3: memref<1x64x8xf32, #tpu.memory_space<vmem>>, %arg4: memref<1x1x8xf32, #tpu.memory_space<vmem>>, %arg5: memref<1x1x8xf32, #tpu.memory_space<vmem>>) attributes {dimension_semantics = [#tpu.dimension_semantics<parallel>], iteration_bounds = array<i64: 2>, scalar_prefetch = 0 : i64, scratch_operands = 0 : i64, tpu.core_type = #tpu.core_type<tc>, window_params = [{transform_indices = @transform_0, window_bounds = array<i64: 4, 9, 9, 4>}, {pipeline_mode = #tpu.pipeline_mode<synchronous>, transform_indices = @transform_1, window_bounds = array<i64: 1, 4, 8>}, {transform_indices = @transform_2, window_bounds = array<i64: 1, 64, 8>}, {transform_indices = @transform_3, window_bounds = array<i64: 1, 1, 8>}, {transform_indices = @transform_4, window_bounds = array<i64: 1, 1, 8>}]} {
    %c3 = arith.constant 3 : index
    %c0 = arith.constant 0 : index
    %c0_0 = arith.constant 0 : index
    %c0_1 = arith.constant 0 : index
    %0 = vector.load %arg1[%c3, %c0, %c0_0, %c0_1] : memref<4x9x9x4xf32, #tpu.memory_space<vmem>>, vector<1x9x9x4xf32>
    %1 = vector.shape_cast %0 : vector<1x9x9x4xf32> to vector<9x9x4xf32>
    %2 = vector.extract_strided_slice %1 {offsets = [0, 0, 0], sizes = [8, 8, 4], strides = [1, 1, 1]} : vector<9x9x4xf32> to vector<8x8x4xf32>
    %3 = vector.shape_cast %2 : vector<8x8x4xf32> to vector<64x4xf32>
    %c0_2 = arith.constant 0 : index
    %c0_3 = arith.constant 0 : index
    %c0_4 = arith.constant 0 : index
    %4 = vector.load %arg2[%c0_2, %c0_3, %c0_4] : memref<1x4x8xf32, #tpu.memory_space<vmem>>, vector<1x4x8xf32>
    %5 = vector.shape_cast %4 : vector<1x4x8xf32> to vector<4x8xf32>
    %cst = arith.constant dense<0.000000e+00> : vector<64x8xf32>
    %6 = tpu.matmul %3, %5, %cst {dimension_numbers = #tpu.dot_dimension_numbers<[1], [0], [0], [1], [0, 0, 1, 1], [], []>} : vector<64x4xf32>, vector<4x8xf32>, vector<64x8xf32> -> vector<64x8xf32>
    %7 = vector.shape_cast %6 : vector<64x8xf32> to vector<1x64x8xf32>
    %c0_5 = arith.constant 0 : index
    %c0_6 = arith.constant 0 : index
    %c0_7 = arith.constant 0 : index
    %8 = vector.load %arg3[%c0_5, %c0_6, %c0_7] : memref<1x64x8xf32, #tpu.memory_space<vmem>>, vector<1x64x8xf32>
    tpu.vector_store %arg3[%c0_5, %c0_6, %c0_7], %7 {strides = array<i32>} : memref<1x64x8xf32, #tpu.memory_space<vmem>>, vector<1x64x8xf32>,
    %cst_8 = arith.constant dense<0.000000e+00> : vector<8xf32>
    %9 = vector.multi_reduction <add>, %6, %cst_8 [0] : vector<64x8xf32> to vector<8xf32>
    %10 = vector.shape_cast %9 : vector<8xf32> to vector<1x8xf32>
    %11 = vector.shape_cast %10 : vector<1x8xf32> to vector<1x1x8xf32>
    %c0_9 = arith.constant 0 : index
    %c0_10 = arith.constant 0 : index
    %c0_11 = arith.constant 0 : index
    %12 = vector.load %arg4[%c0_9, %c0_10, %c0_11] : memref<1x1x8xf32, #tpu.memory_space<vmem>>, vector<1x1x8xf32>
    tpu.vector_store %arg4[%c0_9, %c0_10, %c0_11], %11 {strides = array<i32>} : memref<1x1x8xf32, #tpu.memory_space<vmem>>, vector<1x1x8xf32>,
    %13 = arith.mulf %6, %6 : vector<64x8xf32>
    %cst_12 = arith.constant dense<0.000000e+00> : vector<8xf32>
    %14 = vector.multi_reduction <add>, %13, %cst_12 [0] : vector<64x8xf32> to vector<8xf32>
    %15 = vector.shape_cast %14 : vector<8xf32> to vector<1x8xf32>
    %16 = vector.shape_cast %15 : vector<1x8xf32> to vector<1x1x8xf32>
    %c0_13 = arith.constant 0 : index
    %c0_14 = arith.constant 0 : index
    %c0_15 = arith.constant 0 : index
    %17 = vector.load %arg5[%c0_13, %c0_14, %c0_15] : memref<1x1x8xf32, #tpu.memory_space<vmem>>, vector<1x1x8xf32>
    tpu.vector_store %arg5[%c0_13, %c0_14, %c0_15], %16 {strides = array<i32>} : memref<1x1x8xf32, #tpu.memory_space<vmem>>, vector<1x1x8xf32>,
    return
  }
  func.func @transform_0(%arg0: i32) -> (i32, i32, i32, i32) {
    %c0_i32 = arith.constant 0 : i32
    %c0_i32_0 = arith.constant 0 : i32
    %c0_i32_1 = arith.constant 0 : i32
    %c0_i32_2 = arith.constant 0 : i32
    return %arg0, %c0_i32, %c0_i32_0, %c0_i32_1 : i32, i32, i32, i32
  }
  func.func @transform_1(%arg0: i32) -> (i32, i32, i32) {
    %c0_i32 = arith.constant 0 : i32
    %c0_i32_0 = arith.constant 0 : i32
    %c0_i32_1 = arith.constant 0 : i32
    %c0_i32_2 = arith.constant 0 : i32
    return %c0_i32, %c0_i32_0, %c0_i32_1 : i32, i32, i32
  }
  func.func @transform_2(%arg0: i32) -> (i32, i32, i32) {
    %c0_i32 = arith.constant 0 : i32
    %c0_i32_0 = arith.constant 0 : i32
    %c0_i32_1 = arith.constant 0 : i32
    return %arg0, %c0_i32, %c0_i32_0 : i32, i32, i32
  }
  func.func @transform_3(%arg0: i32) -> (i32, i32, i32) {
    %c0_i32 = arith.constant 0 : i32
    %c0_i32_0 = arith.constant 0 : i32
    %c0_i32_1 = arith.constant 0 : i32
    return %arg0, %c0_i32, %c0_i32_0 : i32, i32, i32
  }
  func.func @transform_4(%arg0: i32) -> (i32, i32, i32) {
    %c0_i32 = arith.constant 0 : i32
    %c0_i32_0 = arith.constant 0 : i32
    %c0_i32_1 = arith.constant 0 : i32
    return %arg0, %c0_i32, %c0_i32_0 : i32, i32, i32
  }
}

module attributes {stable_mosaic.version = 11 : i64} {
  func.func @_bn_apply_kernel(%arg0: i32, %arg1: memref<1x64x8xf32, #tpu.memory_space<vmem>>, %arg2: memref<1x8xf32, #tpu.memory_space<vmem>>, %arg3: memref<1x8xf32, #tpu.memory_space<vmem>>, %arg4: memref<1x64x8xf32, #tpu.memory_space<vmem>>, %arg5: memref<1x8xf32, #tpu.memory_space<vmem>>, %arg6: memref<1x8xf32, #tpu.memory_space<vmem>>, %arg7: memref<1x64x8xf32, #tpu.memory_space<vmem>>) attributes {dimension_semantics = [#tpu.dimension_semantics<parallel>], iteration_bounds = array<i64: 2>, scalar_prefetch = 0 : i64, scratch_operands = 0 : i64, tpu.core_type = #tpu.core_type<tc>, window_params = [{transform_indices = @transform_0, window_bounds = array<i64: 1, 64, 8>}, {pipeline_mode = #tpu.pipeline_mode<synchronous>, transform_indices = @transform_1, window_bounds = array<i64: 1, 8>}, {pipeline_mode = #tpu.pipeline_mode<synchronous>, transform_indices = @transform_2, window_bounds = array<i64: 1, 8>}, {transform_indices = @transform_3, window_bounds = array<i64: 1, 64, 8>}, {pipeline_mode = #tpu.pipeline_mode<synchronous>, transform_indices = @transform_4, window_bounds = array<i64: 1, 8>}, {pipeline_mode = #tpu.pipeline_mode<synchronous>, transform_indices = @transform_5, window_bounds = array<i64: 1, 8>}, {transform_indices = @transform_6, window_bounds = array<i64: 1, 64, 8>}]} {
    %c0 = arith.constant 0 : index
    %c0_0 = arith.constant 0 : index
    %c0_1 = arith.constant 0 : index
    %0 = vector.load %arg1[%c0, %c0_0, %c0_1] : memref<1x64x8xf32, #tpu.memory_space<vmem>>, vector<1x64x8xf32>
    %c0_2 = arith.constant 0 : index
    %c0_3 = arith.constant 0 : index
    %1 = vector.load %arg2[%c0_2, %c0_3] : memref<1x8xf32, #tpu.memory_space<vmem>>, vector<1x8xf32>
    %2 = vector.shape_cast %1 : vector<1x8xf32> to vector<1x1x8xf32>
    %3 = vector.broadcast %2 : vector<1x1x8xf32> to vector<1x64x8xf32>
    %4 = arith.mulf %0, %3 : vector<1x64x8xf32>
    %c0_4 = arith.constant 0 : index
    %c0_5 = arith.constant 0 : index
    %5 = vector.load %arg3[%c0_4, %c0_5] : memref<1x8xf32, #tpu.memory_space<vmem>>, vector<1x8xf32>
    %6 = vector.shape_cast %5 : vector<1x8xf32> to vector<1x1x8xf32>
    %7 = vector.broadcast %6 : vector<1x1x8xf32> to vector<1x64x8xf32>
    %8 = arith.addf %4, %7 : vector<1x64x8xf32>
    %c0_6 = arith.constant 0 : index
    %c0_7 = arith.constant 0 : index
    %c0_8 = arith.constant 0 : index
    %9 = vector.load %arg4[%c0_6, %c0_7, %c0_8] : memref<1x64x8xf32, #tpu.memory_space<vmem>>, vector<1x64x8xf32>
    %c0_9 = arith.constant 0 : index
    %c0_10 = arith.constant 0 : index
    %10 = vector.load %arg5[%c0_9, %c0_10] : memref<1x8xf32, #tpu.memory_space<vmem>>, vector<1x8xf32>
    %11 = vector.shape_cast %10 : vector<1x8xf32> to vector<1x1x8xf32>
    %12 = vector.broadcast %11 : vector<1x1x8xf32> to vector<1x64x8xf32>
    %13 = arith.mulf %9, %12 : vector<1x64x8xf32>
    %c0_11 = arith.constant 0 : index
    %c0_12 = arith.constant 0 : index
    %14 = vector.load %arg6[%c0_11, %c0_12] : memref<1x8xf32, #tpu.memory_space<vmem>>, vector<1x8xf32>
    %15 = vector.shape_cast %14 : vector<1x8xf32> to vector<1x1x8xf32>
    %16 = vector.broadcast %15 : vector<1x1x8xf32> to vector<1x64x8xf32>
    %17 = arith.addf %13, %16 : vector<1x64x8xf32>
    %18 = arith.addf %8, %17 : vector<1x64x8xf32>
    %cst = arith.constant 0.000000e+00 : f32
    %19 = vector.broadcast %cst : f32 to vector<1x64x8xf32>
    %20 = arith.maximumf %18, %19 : vector<1x64x8xf32>
    %c0_13 = arith.constant 0 : index
    %c0_14 = arith.constant 0 : index
    %c0_15 = arith.constant 0 : index
    %21 = vector.load %arg7[%c0_13, %c0_14, %c0_15] : memref<1x64x8xf32, #tpu.memory_space<vmem>>, vector<1x64x8xf32>
    tpu.vector_store %arg7[%c0_13, %c0_14, %c0_15], %20 {strides = array<i32>} : memref<1x64x8xf32, #tpu.memory_space<vmem>>, vector<1x64x8xf32>,
    return
  }
  func.func @transform_0(%arg0: i32) -> (i32, i32, i32) {
    %c0_i32 = arith.constant 0 : i32
    %c0_i32_0 = arith.constant 0 : i32
    %c0_i32_1 = arith.constant 0 : i32
    return %arg0, %c0_i32, %c0_i32_0 : i32, i32, i32
  }
  func.func @transform_1(%arg0: i32) -> (i32, i32) {
    %c0_i32 = arith.constant 0 : i32
    %c0_i32_0 = arith.constant 0 : i32
    %c0_i32_1 = arith.constant 0 : i32
    return %c0_i32, %c0_i32_0 : i32, i32
  }
  func.func @transform_2(%arg0: i32) -> (i32, i32) {
    %c0_i32 = arith.constant 0 : i32
    %c0_i32_0 = arith.constant 0 : i32
    %c0_i32_1 = arith.constant 0 : i32
    return %c0_i32, %c0_i32_0 : i32, i32
  }
  func.func @transform_3(%arg0: i32) -> (i32, i32, i32) {
    %c0_i32 = arith.constant 0 : i32
    %c0_i32_0 = arith.constant 0 : i32
    %c0_i32_1 = arith.constant 0 : i32
    return %arg0, %c0_i32, %c0_i32_0 : i32, i32, i32
  }
  func.func @transform_4(%arg0: i32) -> (i32, i32) {
    %c0_i32 = arith.constant 0 : i32
    %c0_i32_0 = arith.constant 0 : i32
    %c0_i32_1 = arith.constant 0 : i32
    return %c0_i32, %c0_i32_0 : i32, i32
  }
  func.func @transform_5(%arg0: i32) -> (i32, i32) {
    %c0_i32 = arith.constant 0 : i32
    %c0_i32_0 = arith.constant 0 : i32
    %c0_i32_1 = arith.constant 0 : i32
    return %c0_i32, %c0_i32_0 : i32, i32
  }
  func.func @transform_6(%arg0: i32) -> (i32, i32, i32) {
    %c0_i32 = arith.constant 0 : i32
    %c0_i32_0 = arith.constant 0 : i32
    %c0_i32_1 = arith.constant 0 : i32
    return %arg0, %c0_i32, %c0_i32_0 : i32, i32, i32
  }
}

</mosaic_0001>

<bundles_post_ra>
// kernel: residual_block.6
= control target key start
LH: loop header
LB: loop body
LE: loop exit
PB: predicated region body
PF: predicated region fallthrough
CT: control target
= control target key end

     0   :  { %s332_s12 = smov 0   ;;  %s363_s0 = inlined_call_operand.vmem [shape: f32[2,64,8], index: 0, kind: input, shape index: {}]   ;;  %s364_s1 = inlined_call_operand.vmem [shape: f32[1,8], index: 1, kind: input, shape index: {}]   ;;  %s365_s2 = inlined_call_operand.vmem [shape: f32[1,8], index: 2, kind: input, shape index: {}]   ;;  %s366_s3 = inlined_call_operand.vmem [shape: f32[2,64,8], index: 3, kind: output, shape index: {}]  }
   0x1 LB: > { %s281_s13 = sadd.s32 4294967295, %s310_s12   ;;  %p285_p0 = scmp.ge.s32.totalorder %s310_s12, 1  ;;  %s310_s12 = sphi %s332_s12, %s13_s12  }
   0x2   : > { %p137_p1 = scmp.lt.s32.totalorder %s310_s12, 3 }
   0x4   : > { %p138_p2 = pnand %p285_p0, %p137_p1 }
   0x5   : > { %p161_p3 = scmp.lt.s32.totalorder (!%p138_p2), %s281_s13, 1  ;;  %v290_v0 = vld [vmem:[%s364_s1] ss:$0 sm:$0xff] (!%p138_p2)  ;;  %vm217_vm0 = vcmask (!%p138_p2), 64512  }
   0x6   : > { %141 = sbr.rel (%p138_p2) target bundleno = 27 (0x1b), region = 32  ;;  %v291_v1 = vld [vmem:[%s365_s2] ss:$0 sm:$0xff] (!%p138_p2) }
   0xd   : > { %s368_s13 = smov (!%p161_p3, %s281_s13), 1 }
   0xe   : > { %s294_s14 = sshll.u32 %s368_s13, 6 }
   0xf   : > { %s165_s19 = scalar_lea.vmem %s363_s0, %s294_s14  ;;  %s170_s24 = scalar_lea.vmem %s366_s3, %s294_s14 }
  0x10   : > { %v171_v2 = vld [vmem:[%s165_s19] sm:$0xff]  ;;  %v172_v3 = vld [vmem:[%s165_s19 + $0x8] sm:$0xff]  ;;  %v173_v4 = vld [vmem:[%s165_s19 + $0x10] sm:$0xff] }
  0x11   : > { %v186_v5 = vmul.f32 %v290_v0, %v171_v2  ;;  %v187_v6 = vmul.f32 %v290_v0, %v172_v3  ;;  %v188_v7 = vmul.f32 %v290_v0, %v173_v4  ;;  %v174_v8 = vld [vmem:[%s165_s19 + $0x18] sm:$0xff]  ;;  %v175_v9 = vld [vmem:[%s165_s19 + $0x20] sm:$0xff]  ;;  %v176_v10 = vld [vmem:[%s165_s19 + $0x28] sm:$0xff] }
  0x12   : > { %v189_v11 = vmul.f32 %v290_v0, %v174_v8  ;;  %v190_v12 = vmul.f32 %v290_v0, %v175_v9  ;;  %v191_v13 = vmul.f32 %v290_v0, %v176_v10  ;;  %v177_v14 = vld [vmem:[%s165_s19 + $0x30] sm:$0xff]  ;;  %v178_v15 = vld [vmem:[%s165_s19 + $0x38] sm:$0xff] }
  0x13   : > { %v201_v16 = vadd.f32 %v291_v1, %v186_v5  ;;  %v202_v17 = vadd.f32 %v291_v1, %v187_v6  ;;  %v203_v18 = vadd.f32 %v291_v1, %v188_v7  ;;  %v192_v19 = vmul.f32 %v290_v0, %v177_v14 }
  0x14   : > { %v204_v20 = vadd.f32 %v291_v1, %v189_v11  ;;  %v205_v21 = vadd.f32 %v291_v1, %v190_v12  ;;  %v206_v22 = vadd.f32 %v291_v1, %v191_v13  ;;  %v193_v23 = vmul.f32 %v290_v0, %v178_v15 }
  0x15   : > { %v209_v24 = vmax.f32 %v201_v16, 0.0  ;;  %v210_v25 = vmax.f32 %v202_v17, 0.0  ;;  %v211_v26 = vmax.f32 %v203_v18, 0.0  ;;  %v207_v27 = vadd.f32 %v291_v1, %v192_v19 }
  0x16   : > { %v212_v28 = vmax.f32 %v204_v20, 0.0  ;;  %v213_v29 = vmax.f32 %v205_v21, 0.0  ;;  %v214_v30 = vmax.f32 %v206_v22, 0.0  ;;  %v208_v31 = vadd.f32 %v291_v1, %v193_v23 }
  0x17   : > { %218 = vst.msk [vmem:[%s170_s24] sm:$0xff] %vm217_vm0, %v209_v24  ;;  %219 = vst.msk [vmem:[%s170_s24 + $0x8] sm:$0xff] %vm217_vm0, %v210_v25  ;;  %v215_v32 = vmax.f32 %v207_v27, 0.0 }
  0x18   : > { %220 = vst.msk [vmem:[%s170_s24 + $0x10] sm:$0xff] %vm217_vm0, %v211_v26  ;;  %221 = vst.msk [vmem:[%s170_s24 + $0x18] sm:$0xff] %vm217_vm0, %v212_v28  ;;  %v216_v33 = vmax.f32 %v208_v31, 0.0 }
  0x19   : > { %222 = vst.msk [vmem:[%s170_s24 + $0x20] sm:$0xff] %vm217_vm0, %v213_v29  ;;  %223 = vst.msk [vmem:[%s170_s24 + $0x28] sm:$0xff] %vm217_vm0, %v214_v30 }
  0x1a   : > { %224 = vst.msk [vmem:[%s170_s24 + $0x30] sm:$0xff] %vm217_vm0, %v215_v32  ;;  %225 = vst.msk [vmem:[%s170_s24 + $0x38] sm:$0xff] %vm217_vm0, %v216_v33 }
  0x1b PF: > { %s13_s12 = sadd.s32 1, %s310_s12  }
  0x1c   : > { %p10_p4 = scmp.ge.s32.totalorder %s13_s12, 4  }
  0x1e   :  { %12 = sbr.rel (!%p10_p4) target bundleno = 1 (0x1), region = 62 }

// kernel: residual_block.5
= control target key start
LH: loop header
LB: loop body
LE: loop exit
PB: predicated region body
PF: predicated region fallthrough
CT: control target
= control target key end

     0   :  { %s2142_s15 = smov 0   ;;  %s2468_s0 = inlined_call_operand.vmem [shape: f32[8,9,9,4], index: 0, kind: input, shape index: {}]   ;;  %s2469_s1 = inlined_call_operand.vmem [shape: f32[9,4,8], index: 1, kind: input, shape index: {}]   ;;  %s2470_s2 = inlined_call_operand.vmem [shape: f32[2,64,8], index: 2, kind: output, shape index: {0}]   ;;  %s2471_s3 = inlined_call_operand.vmem [shape: f32[2,1,8], index: 3, kind: output, shape index: {1}]   ;;  %s2472_s4 = inlined_call_operand.vmem [shape: f32[2,1,8], index: 4, kind: output, shape index: {2}]  }
   0x1 LB: > { %s2148_s16 = sadd.s32 4294967295, %s2115_s15   ;;  %p1697_p0 = scmp.ge.s32.totalorder %s2115_s15, 1  ;;  %s2115_s15 = sphi %s2142_s15, %s15_s15  }
   0x2   : > { %p169_p1 = scmp.lt.s32.totalorder %s2115_s15, 3 }
   0x4   : > { %p170_p2 = pnand %p1697_p0, %p169_p1 }
   0x5   : > { %v1711_v0 = vld [vmem:[%s2469_s1 + $0x4] sm:$0xf] (!%p170_p2)  ;;  %vm276_vm0 = vcmask (!%p170_p2), 1043456   ;;  %v2158_v1 = vld [vmem:[%s2469_s1 + $0x10] sm:$0xf] (!%p170_p2)  ;;  %s1698_s21 = sshll.u32 (!%p170_p2), %s2148_s16, 2 }
   0x6   : > { %173 = sbr.rel (%p170_p2) target bundleno = 323 (0x143), region = 28  ;;  %1908 = vmatprep.subr.msk.mxu1 (!%p170_p2), %vm276_vm0, %v1711_v0  ;;  %1964 = vmatprep.subr.msk.mxu0 (!%p170_p2), %vm276_vm0, %v2158_v1  ;;  %p203_p3 = scmp.lt.s32.totalorder (!%p170_p2), %s1698_s21, 7  ;;  %v238_v2 = vld [vmem:[%s2469_s1] sm:$0xf] (!%p170_p2)  ;;  %v1784_v3 = vld [vmem:[%s2469_s1 + $0x14] sm:$0xf] (!%p170_p2) }
   0x7   : > { %1909 = vmatpush3.msk.msra.mxu1 (!%p170_p2), %vm276_vm0, %v1711_v0  ;;  %1965 = vmatpush3.msk.msra.mxu0 (!%p170_p2), %vm276_vm0, %v2158_v1  ;;  %vm251_vm1 = vcmask (!%p170_p2), 31744   ;;  %v1794_v11 = vld [vmem:[%s2469_s1 + $0x18] sm:$0xf] (!%p170_p2)  ;;  %v2204_v12 = vld [vmem:[%s2469_s1 + $0x8] sm:$0xf] (!%p170_p2)  ;;  %vm525_vm2 = vcmask (!%p170_p2), 1046528  }
   0x8   : > { %1922 = vmatprep.subr.msk.mxu1 (!%p170_p2), %vm276_vm0, %v238_v2  ;;  %1978 = vmatprep.subr.msk.mxu0 (!%p170_p2), %vm276_vm0, %v1784_v3  ;;  %v1804_v42 = vld [vmem:[%s2469_s1 + $0x1c] sm:$0xf] (!%p170_p2)  ;;  %v1756_v61 = vld [vmem:[%s2469_s1 + $0xc] sm:$0xf] (!%p170_p2)  ;;  %p209_p4 = scmp.lt.s32.totalorder (!%p170_p2), %s2148_s16, 1  ;;  %vm1526_vm3 = vcmask (!%p170_p2), 64512  }
   0x9   : > { %vm1556_vm4 = vcmask (!%p170_p2), 57344  }
   0xd   : > { %s2474_s21 = smov (!%p203_p3, %s1698_s21), 7  ;;  %s2476_s16 = smov (!%p209_p4, %s2148_s16), 1 }
   0xe   : > { %s2100_s26 = smul.u32 144, %s2474_s21  ;;  %s1826_s14 = sshll.u32 %s2476_s16, 6 }
   0xf   : > { %s2423_s19 = scalar_lea.vmem %s2470_s2, %s1826_s14  ;;  %s216_s22 = scalar_lea.vmem %s2471_s3, %s2476_s16 }
  0x10   : > { %s2178_s29 = scalar_lea.vmem %s2468_s0, %s2100_s26  ;;  %s219_s25 = scalar_lea.vmem %s2472_s4, %s2476_s16 }
  0x11   : > { %v1702_v4 = vld [vmem:[%s2178_s29 + $0x90] sm:$0xff]  ;;  %v2183_v6 = vld [vmem:[%s2178_s29 + $0xa0] sm:$0xff]  ;;  %v1741_v15 = vld [vmem:[%s2178_s29 + $0x128] sm:$0x1] }
  0x12   : > { %v1766_v5 = vld [vmem:[%s2178_s29 + $0x1b0] sm:$0xff]  ;;  %1910 = vmatprep.mubr.msk.f32.mxu1 %vm251_vm1, %v1702_v4  ;;  %v1767_v7 = vld [vmem:[%s2178_s29 + $0x1c0] sm:$0xff]  ;;  %v1003_v18 = vrot.slane %v1741_v15, 1  ;;  %v1743_v20 = vld [vmem:[%s2178_s29 + $0x138] sm:$0x1] }
  0x13   : > { %1966 = vmatprep.mubr.msk.f32.mxu0 %vm251_vm1, %v1766_v5  ;;  %v2189_v8 = vld [vmem:[%s2178_s29 + $0xb0] sm:$0xff]  ;;  %1911 = vmatmul.mubr.msk.f32.vlgmr.msra.gmra.mrb[0].mxu1 %vm251_vm1, %v2183_v6  ;;  %v2196_v10 = vld [vmem:[%s2178_s29 + $0xc0] sm:$0xff]  ;;  %v1006_v22 = vrot.slane %v1743_v20, 1  ;;  %v1745_v24 = vld [vmem:[%s2178_s29 + $0x148] sm:$0x1] }
  0x14   : > { %v1768_v9 = vld [vmem:[%s2178_s29 + $0x1d0] sm:$0xff]  ;;  %1967 = vmatmul.mubr.msk.f32.vlgmr.msra.gmra.mrb[0].mxu0 %vm251_vm1, %v1767_v7  ;;  %1923 = vmatpush3.msk.msra.mxu1 %vm276_vm0, %v238_v2  ;;  %v1769_v13 = vld [vmem:[%s2178_s29 + $0x1e0] sm:$0xff]  ;;  %v1009_v27 = vrot.slane %v1745_v24, 1  ;;  %v1747_v29 = vld [vmem:[%s2178_s29 + $0x158] sm:$0x1] }
  0x15   : > { %1979 = vmatpush3.msk.msra.mxu0 %vm276_vm0, %v1784_v3  ;;  %v2210_v14 = vld [vmem:[%s2178_s29 + $0x120] sm:$0xff]  ;;  %1913 = vmatprep.mubr.msk.f32.mxu1 %vm251_vm1, %v2189_v8  ;;  %v2217_v16 = vld [vmem:[%s2178_s29 + $0xd0] sm:$0xff]  ;;  %v1012_v33 = vrot.slane %v1747_v29, 1  ;;  %v1749_v35 = vld [vmem:[%s2178_s29 + $0x168] sm:$0x1] }
  0x16   : > { %1969 = vmatprep.mubr.msk.f32.mxu0 %vm251_vm1, %v1768_v9  ;;  %v1002_v17 = vrot.slane %v2210_v14, 1  ;;  %v2221_v19 = vld [vmem:[%s2178_s29 + $0x130] sm:$0xff]  ;;  %1992 = vmatprep.subr.msk.mxu0 %vm276_vm0, %v1794_v11  ;;  %v2227_v23 = vld [vmem:[%s2178_s29 + $0x140] sm:$0xff]  ;;  %v1015_v38 = vrot.slane %v1749_v35, 1  ;;  %v1751_v40 = vld [vmem:[%s2178_s29 + $0x178] sm:$0x1] }
  0x17   : > { %v1005_v21 = vrot.slane %v2221_v19, 1  ;;  %1936 = vmatprep.subr.msk.mxu1 %vm276_vm0, %v2204_v12  ;;  %1914 = vmatmul.mubr.msk.f32.gmra.mrb[2].mxu1 %vm251_vm1, %v2196_v10  ;;  %v1008_v26 = vrot.slane %v2227_v23, 1  ;;  %v2238_v28 = vld [vmem:[%s2178_s29 + $0x150] sm:$0xff]  ;;  %v2245_v30 = vld [vmem:[%s2178_s29 + $0xe0] sm:$0xff]  ;;  %v1753_v44 = vld [vmem:[%s2178_s29 + $0x188] sm:$0x1] }
  0x18   : > { %1970 = vmatmul.mubr.msk.f32.gmra.mrb[2].mxu0 %vm251_vm1, %v1769_v13  ;;  %v1004_v25 = vsel %vm525_vm2, %v1002_v17, %v1003_v18  ;;  %1916 = vmatprep.mubr.msk.f32.mxu1 %vm251_vm1, %v2217_v16  ;;  %v1011_v32 = vrot.slane %v2238_v28, 1  ;;  %v2250_v34 = vld [vmem:[%s2178_s29 + $0x160] sm:$0xff]  ;;  %v2254_v36 = vld [vmem:[%s2178_s29 + $0xf0] sm:$0xff]  ;;  %v1018_v48 = vrot.slane %v1751_v40, 1  ;;  %v1755_v52 = vld [vmem:[%s2178_s29 + $0x198] sm:$0x1] }
  0x19   : > { %1980 = vmatprep.mubr.msk.f32.mxu0 %vm251_vm1, %v1004_v25  ;;  %v1007_v31 = vsel %vm525_vm2, %v1005_v21, %v1006_v22  ;;  %v1014_v37 = vrot.slane %v2250_v34, 1  ;;  %v2258_v39 = vld [vmem:[%s2178_s29 + $0x170] sm:$0xff]  ;;  %v1010_v41 = vsel %vm525_vm2, %v1008_v26, %v1009_v27  ;;  %v2269_v43 = vld [vmem:[%s2178_s29 + $0x180] sm:$0xff]  ;;  %v1021_v54 = vrot.slane %v1753_v44, 1  ;;  %v221_v2 = vld [vmem:[%s2178_s29 + $0x8] sm:$0x1] }
  0x1a   : > { %v2276_v45 = vld [vmem:[%s2178_s29 + $0x100] sm:$0xff]  ;;  %v1013_v46 = vsel %vm525_vm2, %v1011_v32, %v1012_v33  ;;  %v1017_v47 = vrot.slane %v2258_v39, 1  ;;  %v2284_v51 = vld [vmem:[%s2178_s29 + $0x190] sm:$0xff]  ;;  %v1020_v53 = vrot.slane %v2269_v43, 1  ;;  %v1024_v58 = vrot.slane %v1755_v52, 1 }
  0x1b   : > { %1917 = vmatmul.mubr.msk.f32.gmra.mrb[4].mxu1 %vm251_vm1, %v2245_v30  ;;  %v220_v49 = vld [vmem:[%s2178_s29] sm:$0xff]  ;;  %v1016_v50 = vsel %vm525_vm2, %v1014_v37, %v1015_v38  ;;  %v222_v55 = vld [vmem:[%s2178_s29 + $0x10] sm:$0xff]  ;;  %v1023_v57 = vrot.slane %v2284_v51, 1  ;;  %v527_v7 = vrot.slane %v221_v2, 1  ;;  %v223_v9 = vld [vmem:[%s2178_s29 + $0x18] sm:$0x1] }
  0x1c   : > { %1981 = vmatmul.mubr.msk.f32.vlgmr.msra.gmra.mrb[0].mxu0 %vm251_vm1, %v1007_v31  ;;  %1919 = vmatprep.mubr.msk.f32.mxu1 %vm251_vm1, %v2254_v36  ;;  %v1019_v56 = vsel %vm525_vm2, %v1017_v47, %v1018_v48  ;;  %v224_v59 = vld [vmem:[%s2178_s29 + $0x20] sm:$0xff]  ;;  %v1022_v60 = vsel %vm525_vm2, %v1020_v53, %v1021_v54  ;;  %v226_v62 = vld [vmem:[%s2178_s29 + $0x30] sm:$0xff]  ;;  %v526_v4 = vrot.slane %v220_v49, 1  ;;  %v529_v13 = vrot.slane %v222_v55, 1  ;;  %v227_v22 = vld [vmem:[%s2178_s29 + $0x38] sm:$0x1] }
  0x1d   : > { %1993 = vmatpush3.msk.msra.mxu0 %vm276_vm0, %v1794_v11  ;;  %1983 = vmatprep.mubr.msk.f32.mxu0 %vm251_vm1, %v1010_v41  ;;  %v1025_v63 = vsel %vm525_vm2, %v1023_v57, %v1024_v58  ;;  %v228_v0 = vld [vmem:[%s2178_s29 + $0x40] sm:$0xff]  ;;  %v230_v3 = vld [vmem:[%s2178_s29 + $0x50] sm:$0xff]  ;;  %v225_v11 = vld [vmem:[%s2178_s29 + $0x28] sm:$0x1]  ;;  %v530_v17 = vrot.slane %v223_v9, 1  ;;  %v532_v18 = vrot.slane %v224_v59, 1 }
  0x1e   : > { %2006 = vmatprep.subr.msk.mxu0 %vm276_vm0, %v1804_v42  ;;  %v232_v5 = vld [vmem:[%s2178_s29 + $0x60] sm:$0xff]  ;;  %v234_v15 = vld [vmem:[%s2178_s29 + $0x70] sm:$0xff]  ;;  %v528_v20 = vsel %vm525_vm2, %v526_v4, %v527_v7  ;;  %v533_v21 = vrot.slane %v225_v11, 1  ;;  %v229_v24 = vld [vmem:[%s2178_s29 + $0x48] sm:$0x1]  ;;  %v535_v25 = vrot.slane %v226_v62, 1 }
  0x1f   : > { %1920 = vmatmul.mubr.msk.f32.gmra.mrb[6].mxu1 %vm251_vm1, %v2276_v45  ;;  %v531_v26 = vsel %vm525_vm2, %v529_v13, %v530_v17  ;;  %v536_v27 = vrot.slane %v227_v22, 1  ;;  %v538_v29 = vrot.slane %v228_v0, 1  ;;  %v539_v32 = vrot.slane %v229_v24, 1  ;;  %v231_v33 = vld [vmem:[%s2178_s29 + $0x58] sm:$0x1]  ;;  %v236_v40 = vld [vmem:[%s2178_s29 + $0x80] sm:$0xff] }
  0x20   : > { %1984 = vmatmul.mubr.msk.f32.gmra.mrb[2].mxu0 %vm251_vm1, %v1013_v46  ;;  %1924 = vmatprep.mubr.msk.f32.mxu1 %vm251_vm1, %v220_v49  ;;  %v534_v31 = vsel %vm525_vm2, %v532_v18, %v533_v21  ;;  %v233_v35 = vld [vmem:[%s2178_s29 + $0x68] sm:$0x1]  ;;  %v541_v37 = vrot.slane %v230_v3, 1  ;;  %v542_v41 = vrot.slane %v231_v33, 1  ;;  %v235_v47 = vld [vmem:[%s2178_s29 + $0x78] sm:$0x1] }
  0x21   : > { %1986 = vmatprep.mubr.msk.f32.mxu0 %vm251_vm1, %v1016_v50  ;;  %v537_v38 = vsel %vm525_vm2, %v535_v25, %v536_v27  ;;  %v540_v44 = vsel %vm525_vm2, %v538_v29, %v539_v32  ;;  %v545_v46 = vrot.slane %v233_v35, 1  ;;  %v547_v48 = vrot.slane %v234_v15, 1 }
  0x22   : > { %v543_v49 = vsel %vm525_vm2, %v541_v37, %v542_v41  ;;  %v548_v50 = vrot.slane %v235_v47, 1 }
  0x23   : > { %1925 = vmatmul.mubr.msk.f32.vlgmr.msra.gmra.mrb[0].mxu1 %vm251_vm1, %v222_v55 }
  0x24   : > { %1987 = vmatmul.mubr.msk.f32.gmra.mrb[4].mxu0 %vm251_vm1, %v1019_v56  ;;  %1937 = vmatpush3.msk.msra.mxu1 %vm276_vm0, %v2204_v12  ;;  %v1814_v12 = vld [vmem:[%s2469_s1 + $0x20] sm:$0xf]  ;;  %v549_v53 = vsel %vm525_vm2, %v547_v48, %v548_v50 }
  0x25   : > { %1927 = vmatprep.mubr.msk.f32.mxu1 %vm251_vm1, %v224_v59  ;;  %1989 = vmatprep.mubr.msk.f32.mxu0 %vm251_vm1, %v1022_v60 }
  0x26   : > { %1950 = vmatprep.subr.msk.mxu1 %vm276_vm0, %v1756_v61 }
  0x27   : > { %1928 = vmatmul.mubr.msk.f32.gmra.mrb[2].mxu1 %vm251_vm1, %v226_v62 }
  0x28   : > { %1990 = vmatmul.mubr.msk.f32.gmra.mrb[6].mxu0 %vm251_vm1, %v1025_v63  ;;  %1930 = vmatprep.mubr.msk.f32.mxu1 %vm251_vm1, %v228_v0 }
  0x29   : > { %1994 = vmatprep.mubr.msk.f32.mxu0 %vm251_vm1, %v222_v55 }
  0x2b   : > { %1931 = vmatmul.mubr.msk.f32.gmra.mrb[4].mxu1 %vm251_vm1, %v230_v3 }
  0x2c   : > { %1995 = vmatmul.mubr.msk.f32.vlgmr.msra.gmra.mrb[0].mxu0 %vm251_vm1, %v224_v59  ;;  %1933 = vmatprep.mubr.msk.f32.mxu1 %vm251_vm1, %v232_v5 }
  0x2d   : > { %2007 = vmatpush3.msk.msra.mxu0 %vm276_vm0, %v1804_v42  ;;  %1997 = vmatprep.mubr.msk.f32.mxu0 %vm251_vm1, %v226_v62  ;;  %v544_v42 = vrot.slane %v232_v5, 1 }
  0x2e   : > { %2020 = vmatprep.subr.msk.mxu0 %vm276_vm0, %v1814_v12 }
  0x2f   : > { %1934 = vmatmul.mubr.msk.f32.gmra.mrb[6].mxu1 %vm251_vm1, %v234_v15  ;;  %v546_v52 = vsel %vm525_vm2, %v544_v42, %v545_v46 }
  0x30   : > { %1998 = vmatmul.mubr.msk.f32.gmra.mrb[2].mxu0 %vm251_vm1, %v228_v0  ;;  %1938 = vmatprep.mubr.msk.f32.mxu1 %vm251_vm1, %v528_v20 }
  0x31   : > { %2000 = vmatprep.mubr.msk.f32.mxu0 %vm251_vm1, %v230_v3 }
  0x33   : > { %1939 = vmatmul.mubr.msk.f32.vlgmr.msra.gmra.mrb[0].mxu1 %vm251_vm1, %v531_v26 }
  0x34   : > { %2001 = vmatmul.mubr.msk.f32.gmra.mrb[4].mxu0 %vm251_vm1, %v232_v5  ;;  %1951 = vmatpush3.msk.msra.mxu1 %vm276_vm0, %v1756_v61 }
  0x35   : > { %1941 = vmatprep.mubr.msk.f32.mxu1 %vm251_vm1, %v534_v31  ;;  %2003 = vmatprep.mubr.msk.f32.mxu0 %vm251_vm1, %v234_v15 }
  0x36   : > { %2034 = vmatprep.subr.msk.mxu1 %vm276_vm0, %v2158_v1 }
  0x37   : > { %1942 = vmatmul.mubr.msk.f32.gmra.mrb[2].mxu1 %vm251_vm1, %v537_v38 }
  0x38   : > { %2004 = vmatmul.mubr.msk.f32.gmra.mrb[6].mxu0 %vm251_vm1, %v236_v40  ;;  %1944 = vmatprep.mubr.msk.f32.mxu1 %vm251_vm1, %v540_v44 }
  0x39   : > { %2008 = vmatprep.mubr.msk.f32.mxu0 %vm251_vm1, %v2183_v6  ;;  %v1710_v6 = vld [vmem:[%s2178_s29 + $0x110] sm:$0xff] }
  0x3b   : > { %1945 = vmatmul.mubr.msk.f32.gmra.mrb[4].mxu1 %vm251_vm1, %v543_v49 }
  0x3c   : > { %2009 = vmatmul.mubr.msk.f32.vlgmr.msra.gmra.mrb[0].mxu0 %vm251_vm1, %v2189_v8  ;;  %1947 = vmatprep.mubr.msk.f32.mxu1 %vm251_vm1, %v546_v52  ;;  %v237_v8 = vld [vmem:[%s2178_s29 + $0x88] sm:$0x1] }
  0x3d   : > { %2021 = vmatpush3.msk.msra.mxu0 %vm276_vm0, %v1814_v12  ;;  %2011 = vmatprep.mubr.msk.f32.mxu0 %vm251_vm1, %v2196_v10  ;;  %v1403_v10 = vrot.slane %v236_v40, 1 }
  0x3f   : > { %1948 = vmatmul.mubr.msk.f32.gmra.mrb[6].mxu1 %vm251_vm1, %v549_v53 }
  0x40   : > { %2012 = vmatmul.mubr.msk.f32.gmra.mrb[2].mxu0 %vm251_vm1, %v2217_v16  ;;  %1952 = vmatprep.mubr.msk.f32.mxu1 %vm251_vm1, %v2210_v14  ;;  %v1771_v14 = vld [vmem:[%s2178_s29 + $0x200] sm:$0xff]  ;;  %v1404_v16 = vrot.slane %v237_v8, 1 }
  0x41   : > { %2014 = vmatprep.mubr.msk.f32.mxu0 %vm251_vm1, %v2245_v30 }
  0x43   : > { %1953 = vmatmul.mubr.msk.f32.vlgmr.msra.gmra.mrb[0].mxu1 %vm251_vm1, %v2221_v19  ;;  %v1772_v19 = vld [vmem:[%s2178_s29 + $0x210] sm:$0xff] }
  0x44   : > { %2015 = vmatmul.mubr.msk.f32.gmra.mrb[4].mxu0 %vm251_vm1, %v2254_v36  ;;  %2035 = vmatpush3.msk.msra.mxu1 %vm276_vm0, %v2158_v1  ;;  %v1770_v1 = vld [vmem:[%s2178_s29 + $0x1f0] sm:$0xff] }
  0x45   : > { %1955 = vmatprep.mubr.msk.f32.mxu1 %vm251_vm1, %v2227_v23  ;;  %2017 = vmatprep.mubr.msk.f32.mxu0 %vm251_vm1, %v2276_v45  ;;  %v1773_v23 = vld [vmem:[%s2178_s29 + $0x220] sm:$0xff] }
  0x47   : > { %1956 = vmatmul.mubr.msk.f32.gmra.mrb[2].mxu1 %vm251_vm1, %v2238_v28  ;;  %v1405_v28 = vsel %vm525_vm2, %v1403_v10, %v1404_v16 }
  0x48   : > { %2018 = vmatmul.mubr.msk.f32.gmra.mrb[6].mxu0 %vm251_vm1, %v1710_v6  ;;  %1958 = vmatprep.mubr.msk.f32.mxu1 %vm251_vm1, %v2250_v34 }
  0x49   : > { %2022 = vmatprep.mubr.msk.f32.mxu0 %vm251_vm1, %v531_v26 }
  0x4b   : > { %1959 = vmatmul.mubr.msk.f32.gmra.mrb[4].mxu1 %vm251_vm1, %v2258_v39 }
  0x4c   : > { %2023 = vmatmul.mubr.msk.f32.vlgmr.msra.gmra.mrb[0].mxu0 %vm251_vm1, %v534_v31  ;;  %1961 = vmatprep.mubr.msk.f32.mxu1 %vm251_vm1, %v2269_v43 }
  0x4d   : > { %2025 = vmatprep.mubr.msk.f32.mxu0 %vm251_vm1, %v537_v38 }
  0x4f   : > { %1962 = vmatmul.mubr.msk.f32.gmra.mrb[6].mxu1 %vm251_vm1, %v2284_v51 }
  0x50   : > { %2026 = vmatmul.mubr.msk.f32.gmra.mrb[2].mxu0 %vm251_vm1, %v540_v44  ;;  %1972 = vmatprep.mubr.msk.f32.mxu1 %vm251_vm1, %v1770_v1 }
  0x51   : > { %2028 = vmatprep.mubr.msk.f32.mxu0 %vm251_vm1, %v543_v49 }
  0x53   : > { %1973 = vmatmul.mubr.msk.f32.vlgmr.msra.gmra.mrb[4].mxu1 %vm251_vm1, %v1771_v14 }
  0x54   : > { %2029 = vmatmul.mubr.msk.f32.gmra.mrb[4].mxu0 %vm251_vm1, %v546_v52  ;;  %1975 = vmatprep.mubr.msk.f32.mxu1 %vm251_vm1, %v1772_v19 }
  0x55   : > { %2031 = vmatprep.mubr.msk.f32.mxu0 %vm251_vm1, %v549_v53 }
  0x57   : > { %1976 = vmatmul.mubr.msk.f32.gmra.mrb[6].mxu1 %vm251_vm1, %v1773_v23 }
  0x58   : > { %2032 = vmatmul.mubr.msk.f32.gmra.mrb[6].mxu0 %vm251_vm1, %v1405_v28 }
 0x116   : > { %v1954_v30 = vpop.f32.mrb[0].mxu1 }
 0x117   : > { %v796_v34 = vpop.f32.mrb[1].mxu1 }
 0x11a   : > { %v1957_v36 = vpop.f32.mrb[2].mxu1 }
 0x11b   : > { %v806_v39 = vpop.f32.mrb[3].mxu1 }
 0x11f   : > { %v2024_v43 = vpop.f32.mrb[0].mxu0 }
 0x120   : > { %v2036_v45 = vadd.f32 %v2024_v43, %v1954_v30  ;;  %v1479_v51 = vpop.f32.mrb[1].mxu0 }
 0x121   : > { %v2037_v54 = vadd.f32 %v1479_v51, %v796_v34 }
 0x122   : > { %1528 = vst.msk [vmem:[%s2423_s19 + $0x8] sm:$0xff] %vm1526_vm3, %v2036_v45  ;;  %v1536_v55 = vsel %vm1526_vm3, %v2036_v45, 0.0  ;;  %v1559_v56 = vmul.f32 %v2036_v45, %v2036_v45 }
 0x123   : > { %1527 = vst.msk [vmem:[%s2423_s19] sm:$0xff] %vm1526_vm3, %v2037_v54  ;;  %v1535_v57 = vsel %vm1526_vm3, %v2037_v54, 0.0  ;;  %v1558_v58 = vmul.f32 %v2037_v54, %v2037_v54  ;;  %v2027_v59 = vpop.f32.mrb[2].mxu0 }
 0x124   : > { %v1567_v60 = vsel %vm1526_vm3, %v1559_v56, 0.0  ;;  %v1537_v61 = vadd.f32 %v1536_v55, %v1535_v57  ;;  %v2038_v62 = vadd.f32 %v2027_v59, %v1957_v36  ;;  %v1489_v63 = vpop.f32.mrb[3].mxu0 }
 0x125   : > { %v1566_v0 = vsel %vm1526_vm3, %v1558_v58, 0.0  ;;  %v2039_v2 = vadd.f32 %v1489_v63, %v806_v39 }
 0x126   : > { %v1568_v3 = vadd.f32 %v1567_v60, %v1566_v0  ;;  %1530 = vst.msk [vmem:[%s2423_s19 + $0x18] sm:$0xff] %vm1526_vm3, %v2038_v62  ;;  %v1561_v4 = vmul.f32 %v2038_v62, %v2038_v62  ;;  %v1974_v9 = vpop.f32.mrb[4].mxu1  ;;  %v1540_v18 = vsel %vm1526_vm3, %v2038_v62, 0.0 }
 0x127   : > { %1529 = vst.msk [vmem:[%s2423_s19 + $0x10] sm:$0xff] %vm1526_vm3, %v2039_v2  ;;  %v1538_v5 = vsel %vm1526_vm3, %v2039_v2, 0.0  ;;  %v1560_v7 = vmul.f32 %v2039_v2, %v2039_v2  ;;  %v2030_v11 = vpop.f32.mrb[4].mxu0  ;;  %v967_v15 = vpop.f32.mrb[5].mxu1 }
 0x128   : > { %v1539_v12 = vadd.f32 %v1538_v5, %v1537_v61  ;;  %v2040_v13 = vadd.f32 %v2030_v11, %v1974_v9  ;;  %v1499_v17 = vpop.f32.mrb[5].mxu0  ;;  %v1571_v25 = vsel %vm1526_vm3, %v1561_v4, 0.0 }
 0x129   : > { %v1569_v20 = vsel %vm1526_vm3, %v1560_v7, 0.0  ;;  %v2041_v21 = vadd.f32 %v1499_v17, %v967_v15 }
 0x12a   : > { %v1570_v22 = vadd.f32 %v1569_v20, %v1568_v3  ;;  %1532 = vst.msk [vmem:[%s2423_s19 + $0x28] sm:$0xff] %vm1526_vm3, %v2040_v13  ;;  %v1541_v24 = vadd.f32 %v1540_v18, %v1539_v12  ;;  %v1563_v26 = vmul.f32 %v2040_v13, %v2040_v13  ;;  %v1977_v31 = vpop.f32.mrb[6].mxu1  ;;  %v1544_v41 = vsel %vm1526_vm3, %v2040_v13, 0.0 }
 0x12b   : > { %1531 = vst.msk [vmem:[%s2423_s19 + $0x20] sm:$0xff] %vm1526_vm3, %v2041_v21  ;;  %v1542_v27 = vsel %vm1526_vm3, %v2041_v21, 0.0  ;;  %v1562_v29 = vmul.f32 %v2041_v21, %v2041_v21  ;;  %v2033_v32 = vpop.f32.mrb[6].mxu0  ;;  %v977_v38 = vpop.f32.mrb[7].mxu1 }
 0x12c   : > { %v1543_v33 = vadd.f32 %v1542_v27, %v1541_v24  ;;  %v1572_v35 = vadd.f32 %v1571_v25, %v1570_v22  ;;  %v2042_v37 = vadd.f32 %v2033_v32, %v1977_v31  ;;  %v1509_v40 = vpop.f32.mrb[7].mxu0  ;;  %v1575_v48 = vsel %vm1526_vm3, %v1563_v26, 0.0 }
 0x12d   : > { %v1573_v42 = vsel %vm1526_vm3, %v1562_v29, 0.0  ;;  %v2043_v44 = vadd.f32 %v1509_v40, %v977_v38 }
 0x12e   : > { %v1574_v46 = vadd.f32 %v1573_v42, %v1572_v35  ;;  %1534 = vst.msk [vmem:[%s2423_s19 + $0x38] sm:$0xff] %vm1526_vm3, %v2042_v37  ;;  %v1545_v47 = vadd.f32 %v1544_v41, %v1543_v33  ;;  %v1565_v49 = vmul.f32 %v2042_v37, %v2042_v37  ;;  %v1548_v1 = vsel %vm1526_vm3, %v2042_v37, 0.0 }
 0x12f   : > { %1533 = vst.msk [vmem:[%s2423_s19 + $0x30] sm:$0xff] %vm1526_vm3, %v2043_v44  ;;  %v1546_v50 = vsel %vm1526_vm3, %v2043_v44, 0.0  ;;  %v1564_v52 = vmul.f32 %v2043_v44, %v2043_v44 }
 0x130   : > { %v1547_v53 = vadd.f32 %v1546_v50, %v1545_v47  ;;  %v1576_v6 = vadd.f32 %v1575_v48, %v1574_v46  ;;  %v1579_v16 = vsel %vm1526_vm3, %v1565_v49, 0.0 }
 0x131   : > { %v1577_v8 = vsel %vm1526_vm3, %v1564_v52, 0.0 }
 0x132   : > { %v1549_v10 = vadd.f32 %v1548_v1, %v1547_v53  ;;  %v1578_v14 = vadd.f32 %v1577_v8, %v1576_v6 }
 0x134   : > { %v1550_v19 = vrot.slane %v1549_v10, 4  ;;  %v1580_v23 = vadd.f32 %v1579_v16, %v1578_v14 }
 0x136   : > { %v1551_v28 = vadd.f32 %v1550_v19, %v1549_v10  ;;  %v1581_v30 = vrot.slane %v1580_v23, 4 }
 0x138   : > { %v1552_v34 = vrot.slane %v1551_v28, 2  ;;  %v1582_v36 = vadd.f32 %v1581_v30, %v1580_v23 }
 0x13a   : > { %v1553_v39 = vadd.f32 %v1552_v34, %v1551_v28  ;;  %v1583_v43 = vrot.slane %v1582_v36, 2 }
 0x13c   : > { %v1554_v45 = vrot.slane %v1553_v39, 1  ;;  %v1584_v51 = vadd.f32 %v1583_v43, %v1582_v36 }
 0x13e   : > { %v1555_v54 = vadd.f32 %v1554_v45, %v1553_v39  ;;  %v1585_v55 = vrot.slane %v1584_v51, 1 }
 0x140   : > { %1557 = vst.msk [vmem:[%s216_s22] sm:$0x1] %vm1556_vm4, %v1555_v54  ;;  %v1586_v56 = vadd.f32 %v1585_v55, %v1584_v51 }
 0x142   : > { %1587 = vst.msk [vmem:[%s219_s25] sm:$0x1] %vm1556_vm4, %v1586_v56 }
 0x143 PF: > { %s15_s15 = sadd.s32 1, %s2115_s15  }
 0x144   : > { %p12_p5 = scmp.ge.s32.totalorder %s15_s15, 4  }
 0x146   :  { %14 = sbr.rel (!%p12_p5) target bundleno = 1 (0x1), region = 93 }

// kernel: residual_block.8
= control target key start
LH: loop header
LB: loop body
LE: loop exit
PB: predicated region body
PF: predicated region fallthrough
CT: control target
= control target key end

     0   :  { %s627_s15 = smov 0   ;;  %s695_s0 = inlined_call_operand.vmem [shape: f32[8,9,9,4], index: 0, kind: input, shape index: {}]   ;;  %s696_s1 = inlined_call_operand.vmem [shape: f32[1,4,8], index: 1, kind: input, shape index: {}]   ;;  %s697_s2 = inlined_call_operand.vmem [shape: f32[2,64,8], index: 2, kind: output, shape index: {0}]   ;;  %s698_s3 = inlined_call_operand.vmem [shape: f32[2,1,8], index: 3, kind: output, shape index: {1}]   ;;  %s699_s4 = inlined_call_operand.vmem [shape: f32[2,1,8], index: 4, kind: output, shape index: {2}]  }
   0x1 LB: > { %s633_s16 = sadd.s32 4294967295, %s600_s15   ;;  %p535_p0 = scmp.ge.s32.totalorder %s600_s15, 1  ;;  %s600_s15 = sphi %s627_s15, %s15_s15  }
   0x2   : > { %p169_p1 = scmp.lt.s32.totalorder %s600_s15, 3 }
   0x4   : > { %p170_p2 = pnand %p535_p0, %p169_p1 }
   0x5   : > { %v229_v0 = vld [vmem:[%s696_s1] sm:$0xf] (!%p170_p2)  ;;  %vm255_vm0 = vcmask (!%p170_p2), 1043456   ;;  %s536_s19 = sshll.u32 (!%p170_p2), %s633_s16, 2  ;;  %vm230_vm1 = vcmask (!%p170_p2), 31744   ;;  %p209_p4 = scmp.lt.s32.totalorder (!%p170_p2), %s633_s16, 1 }
   0x6   : > { %173 = sbr.rel (%p170_p2) target bundleno = 264 (0x108), region = 28  ;;  %569 = vmatprep.subr.msk.mxu0 (!%p170_p2), %vm255_vm0, %v229_v0  ;;  %p203_p3 = scmp.lt.s32.totalorder (!%p170_p2), %s536_s19, 7  ;;  %583 = vmatprep.subr.msk.mxu1 (!%p170_p2), %vm255_vm0, %v229_v0  ;;  %vm364_vm2 = vcmask (!%p170_p2), 64512   ;;  %vm394_vm3 = vcmask (!%p170_p2), 57344  }
   0x7   : > { %570 = vmatpush3.msk.msra.mxu0 (!%p170_p2), %vm255_vm0, %v229_v0  ;;  %584 = vmatpush3.msk.msra.mxu1 (!%p170_p2), %vm255_vm0, %v229_v0 }
   0xd   : > { %s701_s19 = smov (!%p203_p3, %s536_s19), 7  ;;  %s703_s16 = smov (!%p209_p4, %s633_s16), 1 }
   0xe   : > { %s585_s20 = smul.u32 144, %s701_s19  ;;  %s559_s24 = sshll.u32 %s703_s16, 6 }
   0xf   : > { %s213_s27 = scalar_lea.vmem %s697_s2, %s559_s24  ;;  %s216_s30 = scalar_lea.vmem %s698_s3, %s703_s16 }
  0x10   : > { %s207_s23 = scalar_lea.vmem %s695_s0, %s585_s20  ;;  %s219_s7 = scalar_lea.vmem %s699_s4, %s703_s16 }
  0x11   : > { %v540_v1 = vld [vmem:[%s207_s23 + $0x1b0] sm:$0xff]  ;;  %v541_v2 = vld [vmem:[%s207_s23 + $0x1c0] sm:$0xff] }
  0x12   : > { %v542_v3 = vld [vmem:[%s207_s23 + $0x1d0] sm:$0xff]  ;;  %571 = vmatprep.mubr.msk.f32.mxu0 %vm230_vm1, %v540_v1  ;;  %v545_v5 = vld [vmem:[%s207_s23 + $0x200] sm:$0xff] }
  0x13   : > { %v544_v4 = vld [vmem:[%s207_s23 + $0x1f0] sm:$0xff]  ;;  %572 = vmatmul.mubr.msk.f32.vlgmr.msra.gmra.mrb[0].mxu0 %vm230_vm1, %v541_v2  ;;  %v543_v7 = vld [vmem:[%s207_s23 + $0x1e0] sm:$0xff] }
  0x14   : > { %577 = vmatprep.mubr.msk.f32.mxu1 %vm230_vm1, %v544_v4  ;;  %v546_v6 = vld [vmem:[%s207_s23 + $0x210] sm:$0xff]  ;;  %574 = vmatprep.mubr.msk.f32.mxu0 %vm230_vm1, %v542_v3  ;;  %v547_v8 = vld [vmem:[%s207_s23 + $0x220] sm:$0xff] }
  0x15   : > { %578 = vmatmul.mubr.msk.f32.vlgmr.msra.gmra.mrb[0].mxu1 %vm230_vm1, %v545_v5 }
  0x16   : > { %580 = vmatprep.mubr.msk.f32.mxu1 %vm230_vm1, %v546_v6 }
  0x17   : > { %575 = vmatmul.mubr.msk.f32.gmra.mrb[2].mxu0 %vm230_vm1, %v543_v7 }
  0x19   : > { %581 = vmatmul.mubr.msk.f32.gmra.mrb[2].mxu1 %vm230_vm1, %v547_v8 }
  0xe6   : > { %v573_v9 = vpop.f32.mrb[0].mxu0 }
  0xe7   : > { %366 = vst.msk [vmem:[%s213_s27 + $0x8] sm:$0xff] %vm364_vm2, %v573_v9  ;;  %v374_v10 = vsel %vm364_vm2, %v573_v9, 0.0  ;;  %v397_v11 = vmul.f32 %v573_v9, %v573_v9  ;;  %v325_v12 = vpop.f32.mrb[1].mxu0 }
  0xe8   : > { %v579_v13 = vpop.f32.mrb[0].mxu1  ;;  %365 = vst.msk [vmem:[%s213_s27] sm:$0xff] %vm364_vm2, %v325_v12  ;;  %v373_v14 = vsel %vm364_vm2, %v325_v12, 0.0  ;;  %v396_v15 = vmul.f32 %v325_v12, %v325_v12 }
  0xe9   : > { %370 = vst.msk [vmem:[%s213_s27 + $0x28] sm:$0xff] %vm364_vm2, %v579_v13  ;;  %v345_v16 = vpop.f32.mrb[1].mxu1  ;;  %v405_v17 = vsel %vm364_vm2, %v397_v11, 0.0  ;;  %v375_v18 = vadd.f32 %v374_v10, %v373_v14  ;;  %v401_v36 = vmul.f32 %v579_v13, %v579_v13  ;;  %v382_v41 = vsel %vm364_vm2, %v579_v13, 0.0 }
  0xea   : > { %369 = vst.msk [vmem:[%s213_s27 + $0x20] sm:$0xff] %vm364_vm2, %v345_v16  ;;  %v404_v19 = vsel %vm364_vm2, %v396_v15, 0.0  ;;  %v576_v20 = vpop.f32.mrb[2].mxu0  ;;  %v400_v27 = vmul.f32 %v345_v16, %v345_v16  ;;  %v380_v32 = vsel %vm364_vm2, %v345_v16, 0.0 }
  0xeb   : > { %v406_v21 = vadd.f32 %v405_v17, %v404_v19  ;;  %368 = vst.msk [vmem:[%s213_s27 + $0x18] sm:$0xff] %vm364_vm2, %v576_v20  ;;  %v335_v22 = vpop.f32.mrb[3].mxu0  ;;  %v399_v24 = vmul.f32 %v576_v20, %v576_v20  ;;  %v378_v30 = vsel %vm364_vm2, %v576_v20, 0.0  ;;  %v413_v45 = vsel %vm364_vm2, %v401_v36, 0.0 }
  0xec   : > { %v582_v23 = vpop.f32.mrb[2].mxu1  ;;  %367 = vst.msk [vmem:[%s213_s27 + $0x10] sm:$0xff] %vm364_vm2, %v335_v22  ;;  %v376_v25 = vsel %vm364_vm2, %v335_v22, 0.0  ;;  %v398_v26 = vmul.f32 %v335_v22, %v335_v22  ;;  %v411_v37 = vsel %vm364_vm2, %v400_v27, 0.0 }
  0xed   : > { %372 = vst.msk [vmem:[%s213_s27 + $0x38] sm:$0xff] %vm364_vm2, %v582_v23  ;;  %v355_v28 = vpop.f32.mrb[3].mxu1  ;;  %v377_v29 = vadd.f32 %v376_v25, %v375_v18  ;;  %v409_v35 = vsel %vm364_vm2, %v399_v24, 0.0  ;;  %v403_v46 = vmul.f32 %v582_v23, %v582_v23  ;;  %v386_v50 = vsel %vm364_vm2, %v582_v23, 0.0 }
  0xee   : > { %371 = vst.msk [vmem:[%s213_s27 + $0x30] sm:$0xff] %vm364_vm2, %v355_v28  ;;  %v407_v31 = vsel %vm364_vm2, %v398_v26, 0.0  ;;  %v402_v38 = vmul.f32 %v355_v28, %v355_v28  ;;  %v384_v42 = vsel %vm364_vm2, %v355_v28, 0.0 }
  0xef   : > { %v379_v33 = vadd.f32 %v378_v30, %v377_v29  ;;  %v408_v34 = vadd.f32 %v407_v31, %v406_v21  ;;  %v417_v53 = vsel %vm364_vm2, %v403_v46, 0.0 }
  0xf0   : > { %v415_v47 = vsel %vm364_vm2, %v402_v38, 0.0 }
  0xf1   : > { %v410_v39 = vadd.f32 %v409_v35, %v408_v34  ;;  %v381_v40 = vadd.f32 %v380_v32, %v379_v33 }
  0xf3   : > { %v412_v43 = vadd.f32 %v411_v37, %v410_v39  ;;  %v383_v44 = vadd.f32 %v382_v41, %v381_v40 }
  0xf5   : > { %v385_v48 = vadd.f32 %v384_v42, %v383_v44  ;;  %v414_v49 = vadd.f32 %v413_v45, %v412_v43 }
  0xf7   : > { %v387_v51 = vadd.f32 %v386_v50, %v385_v48  ;;  %v416_v52 = vadd.f32 %v415_v47, %v414_v49 }
  0xf9   : > { %v388_v54 = vrot.slane %v387_v51, 4  ;;  %v418_v55 = vadd.f32 %v417_v53, %v416_v52 }
  0xfb   : > { %v389_v56 = vadd.f32 %v388_v54, %v387_v51  ;;  %v419_v57 = vrot.slane %v418_v55, 4 }
  0xfd   : > { %v390_v58 = vrot.slane %v389_v56, 2  ;;  %v420_v59 = vadd.f32 %v419_v57, %v418_v55 }
  0xff   : > { %v391_v60 = vadd.f32 %v390_v58, %v389_v56  ;;  %v421_v61 = vrot.slane %v420_v59, 2 }
 0x101   : > { %v392_v62 = vrot.slane %v391_v60, 1  ;;  %v422_v63 = vadd.f32 %v421_v61, %v420_v59 }
 0x103   : > { %v393_v0 = vadd.f32 %v392_v62, %v391_v60  ;;  %v423_v1 = vrot.slane %v422_v63, 1 }
 0x105   : > { %395 = vst.msk [vmem:[%s216_s30] sm:$0x1] %vm394_vm3, %v393_v0  ;;  %v424_v2 = vadd.f32 %v423_v1, %v422_v63 }
 0x107   : > { %425 = vst.msk [vmem:[%s219_s7] sm:$0x1] %vm394_vm3, %v424_v2 }
 0x108 PF: > { %s15_s15 = sadd.s32 1, %s600_s15  }
 0x109   : > { %p12_p5 = scmp.ge.s32.totalorder %s15_s15, 4  }
 0x10b   :  { %14 = sbr.rel (!%p12_p5) target bundleno = 1 (0x1), region = 83 }

// kernel: residual_block.7
= control target key start
LH: loop header
LB: loop body
LE: loop exit
PB: predicated region body
PF: predicated region fallthrough
CT: control target
= control target key end

     0   :  { %s1968_s15 = smov 0   ;;  %s2313_s0 = inlined_call_operand.vmem [shape: f32[2,10,10,8], index: 0, kind: input, shape index: {}]   ;;  %s2314_s1 = inlined_call_operand.vmem [shape: f32[9,8,8], index: 1, kind: input, shape index: {}]   ;;  %s2315_s2 = inlined_call_operand.vmem [shape: f32[2,64,8], index: 2, kind: output, shape index: {0}]   ;;  %s2316_s3 = inlined_call_operand.vmem [shape: f32[2,1,8], index: 3, kind: output, shape index: {1}]   ;;  %s2317_s4 = inlined_call_operand.vmem [shape: f32[2,1,8], index: 4, kind: output, shape index: {2}]  }
   0x1 LB: > { %s1562_s16 = sadd.s32 4294967295, %s1941_s15   ;;  %p1566_p0 = scmp.ge.s32.totalorder %s1941_s15, 1  ;;  %s1941_s15 = sphi %s1968_s15, %s15_s15  }
   0x2   : > { %p167_p1 = scmp.lt.s32.totalorder %s1941_s15, 3 }
   0x4   : > { %p168_p2 = pnand %p1566_p0, %p167_p1 }
   0x5   : > { %v1570_v0 = vld [vmem:[%s2314_s1 + $0x8] sm:$0xff] (!%p168_p2)  ;;  %v1982_v1 = vld [vmem:[%s2314_s1 + $0x20] sm:$0xff] (!%p168_p2)  ;;  %p199_p3 = scmp.lt.s32.totalorder (!%p168_p2), %s1562_s16, 1  ;;  %vm252_vm0 = vcmask (!%p168_p2), 1046528   ;;  %vm279_vm1 = vcmask (!%p168_p2), 64512   ;;  %vm522_vm2 = vcmask (!%p168_p2), 1045504  }
   0x6   : > { %171 = sbr.rel (%p168_p2) target bundleno = 326 (0x146), region = 28  ;;  %v235_v2 = vld [vmem:[%s2314_s1] sm:$0xff] (!%p168_p2)  ;;  %1734 = vmatprep.subr.mxu1 (!%p168_p2), %v1570_v0  ;;  %1790 = vmatprep.subr.mxu0 (!%p168_p2), %v1982_v1  ;;  %v1614_v3 = vld [vmem:[%s2314_s1 + $0x28] sm:$0xff] (!%p168_p2)  ;;  %v1623_v30 = vld [vmem:[%s2314_s1 + $0x30] sm:$0xff] (!%p168_p2)  ;;  %vm1425_vm3 = vcmask (!%p168_p2), 57344  }
   0x7   : > { %1735 = vmatpush3.msra.mxu1 (!%p168_p2), %v1570_v0  ;;  %1791 = vmatpush3.msra.mxu0 (!%p168_p2), %v1982_v1  ;;  %v1587_v38 = vld [vmem:[%s2314_s1 + $0x10] sm:$0xff] (!%p168_p2)  ;;  %v1632_v58 = vld [vmem:[%s2314_s1 + $0x38] sm:$0xff] (!%p168_p2) }
   0x8   : > { %1748 = vmatprep.subr.mxu1 (!%p168_p2), %v235_v2  ;;  %1804 = vmatprep.subr.mxu0 (!%p168_p2), %v1614_v3 }
   0xd   : > { %s2319_s16 = smov (!%p199_p3, %s1562_s16), 1 }
   0xe   : > { %s1926_s25 = smul.u32 160, %s2319_s16  ;;  %s1652_s13 = sshll.u32 %s2319_s16, 6 }
   0xf   : > { %s2268_s18 = scalar_lea.vmem %s2315_s2, %s1652_s13  ;;  %s211_s21 = scalar_lea.vmem %s2316_s3, %s2319_s16 }
  0x10   : > { %s1998_s28 = scalar_lea.vmem %s2313_s0, %s1926_s25  ;;  %s214_s24 = scalar_lea.vmem %s2317_s4, %s2319_s16 }
  0x11   : > { %v2001_v4 = vld [vmem:[%s1998_s28] sm:$0xff]  ;;  %v2004_v5 = vld [vmem:[%s1998_s28 + $0x8] sm:$0x3]  ;;  %v2007_v6 = vld [vmem:[%s1998_s28 + $0x10] sm:$0xff] }
  0x12   : > { %v253_v7 = vrot.slane %v2001_v4, 1  ;;  %v254_v8 = vrot.slane %v2004_v5, 1  ;;  %v218_v9 = vld [vmem:[%s1998_s28 + $0x18] sm:$0x3]  ;;  %v256_v10 = vrot.slane %v2007_v6, 1  ;;  %v2014_v12 = vld [vmem:[%s1998_s28 + $0x20] sm:$0xff] }
  0x13   : > { %v257_v11 = vrot.slane %v218_v9, 1  ;;  %v220_v13 = vld [vmem:[%s1998_s28 + $0x28] sm:$0x3]  ;;  %v2018_v14 = vld [vmem:[%s1998_s28 + $0x30] sm:$0xff]  ;;  %v527_v16 = vrot.slane %v218_v9, 2  ;;  %v259_v17 = vrot.slane %v2014_v12, 1 }
  0x14   : > { %v255_v15 = vsel %vm252_vm0, %v253_v7, %v254_v8  ;;  %v260_v18 = vrot.slane %v220_v13, 1  ;;  %v222_v19 = vld [vmem:[%s1998_s28 + $0x38] sm:$0x3]  ;;  %v2024_v20 = vld [vmem:[%s1998_s28 + $0x40] sm:$0xff]  ;;  %v262_v22 = vrot.slane %v2018_v14, 1  ;;  %v2032_v26 = vld [vmem:[%s1998_s28 + $0x50] sm:$0xff] }
  0x15   : > { %1736 = vmatprep.mubr.msk.f32.mxu1 %vm279_vm1, %v255_v15  ;;  %v258_v21 = vsel %vm252_vm0, %v256_v10, %v257_v11  ;;  %v263_v23 = vrot.slane %v222_v19, 1  ;;  %v224_v24 = vld [vmem:[%s1998_s28 + $0x48] sm:$0x3]  ;;  %v265_v25 = vrot.slane %v2024_v20, 1  ;;  %v526_v29 = vrot.slane %v2007_v6, 2  ;;  %v2045_v32 = vld [vmem:[%s1998_s28 + $0x60] sm:$0xff] }
  0x16   : > { %1792 = vmatprep.mubr.msk.f32.mxu0 %vm279_vm1, %v258_v21  ;;  %1737 = vmatmul.mubr.msk.f32.vlgmr.msra.gmra.mrb[0].mxu1 %vm279_vm1, %v258_v21  ;;  %v2037_v27 = vsel %vm252_vm0, %v259_v17, %v260_v18  ;;  %v266_v28 = vrot.slane %v224_v24, 1  ;;  %v226_v31 = vld [vmem:[%s1998_s28 + $0x58] sm:$0x3]  ;;  %v530_v33 = vrot.slane %v220_v13, 2  ;;  %v268_v35 = vrot.slane %v2032_v26, 1  ;;  %v2065_v43 = vld [vmem:[%s1998_s28 + $0x70] sm:$0xff] }
  0x17   : > { %1749 = vmatpush3.msra.mxu1 %v235_v2  ;;  %1793 = vmatmul.mubr.msk.f32.vlgmr.msra.gmra.mrb[0].mxu0 %vm279_vm1, %v2037_v27  ;;  %v2050_v34 = vsel %vm252_vm0, %v262_v22, %v263_v23  ;;  %v269_v36 = vrot.slane %v226_v31, 1  ;;  %v228_v37 = vld [vmem:[%s1998_s28 + $0x68] sm:$0x3]  ;;  %v529_v40 = vrot.slane %v2014_v12, 2  ;;  %v271_v41 = vrot.slane %v2045_v32, 1  ;;  %v1596_v13 = vld [vmem:[%s2314_s1 + $0x18] sm:$0xff] }
  0x18   : > { %1805 = vmatpush3.msra.mxu0 %v1614_v3  ;;  %1739 = vmatprep.mubr.msk.f32.mxu1 %vm279_vm1, %v2037_v27  ;;  %v2060_v39 = vsel %vm252_vm0, %v265_v25, %v266_v28  ;;  %v272_v42 = vrot.slane %v228_v37, 1  ;;  %v230_v44 = vld [vmem:[%s1998_s28 + $0x78] sm:$0x3]  ;;  %v2071_v45 = vsel %vm522_vm2, %v526_v29, %v527_v16  ;;  %v532_v46 = vrot.slane %v2018_v14, 2  ;;  %v2120_v3 = vld [vmem:[%s1998_s28 + $0x80] sm:$0xff] }
  0x19   : > { %1795 = vmatprep.mubr.msk.f32.mxu0 %vm279_vm1, %v2050_v34  ;;  %1818 = vmatprep.subr.mxu0 %v1623_v30  ;;  %v533_v47 = vrot.slane %v222_v19, 2  ;;  %v2081_v48 = vsel %vm252_vm0, %v268_v35, %v269_v36  ;;  %v274_v49 = vrot.slane %v2065_v43, 1  ;;  %v275_v50 = vrot.slane %v230_v44, 1  ;;  %v2123_v7 = vld [vmem:[%s1998_s28 + $0x88] sm:$0x3]  ;;  %v1641_v18 = vld [vmem:[%s2314_s1 + $0x40] sm:$0xff] }
  0x1a   : > { %1740 = vmatmul.mubr.msk.f32.gmra.mrb[2].mxu1 %vm279_vm1, %v2050_v34  ;;  %1762 = vmatprep.subr.mxu1 %v1587_v38  ;;  %v2087_v51 = vsel %vm522_vm2, %v529_v40, %v530_v33  ;;  %v2090_v52 = vsel %vm252_vm0, %v271_v41, %v272_v42  ;;  %v535_v53 = vrot.slane %v2024_v20, 2  ;;  %v536_v54 = vrot.slane %v224_v24, 2  ;;  %v234_v22 = vld [vmem:[%s1998_s28 + $0x98] sm:$0x3] }
  0x1b   : > { %1796 = vmatmul.mubr.msk.f32.gmra.mrb[2].mxu0 %vm279_vm1, %v2060_v39  ;;  %1742 = vmatprep.mubr.msk.f32.mxu1 %vm279_vm1, %v2060_v39  ;;  %v2094_v55 = vsel %vm522_vm2, %v532_v46, %v533_v47  ;;  %v538_v56 = vrot.slane %v2032_v26, 2  ;;  %v539_v57 = vrot.slane %v226_v31, 2  ;;  %v2107_v59 = vsel %vm252_vm0, %v274_v49, %v275_v50 }
  0x1c   : > { %1806 = vmatprep.mubr.msk.f32.mxu0 %vm279_vm1, %v2071_v45  ;;  %v2112_v60 = vsel %vm522_vm2, %v535_v53, %v536_v54  ;;  %v541_v61 = vrot.slane %v2045_v32, 2  ;;  %v542_v62 = vrot.slane %v228_v37, 2  ;;  %v544_v0 = vrot.slane %v2065_v43, 2 }
  0x1d   : > { %v2116_v63 = vsel %vm522_vm2, %v538_v56, %v539_v57  ;;  %v545_v2 = vrot.slane %v230_v44, 2  ;;  %v917_v9 = vrot.slane %v2120_v3, 2  ;;  %v918_v10 = vrot.slane %v2123_v7, 2 }
  0x1e   : > { %1743 = vmatmul.mubr.msk.f32.gmra.mrb[4].mxu1 %vm279_vm1, %v2081_v48  ;;  %v2134_v8 = vsel %vm522_vm2, %v541_v61, %v542_v62  ;;  %v524_v16 = vrot.slane %v2004_v5, 2  ;;  %v523_v17 = vrot.slane %v2001_v4, 2  ;;  %v233_v5 = vld [vmem:[%s1998_s28 + $0x90] sm:$0xff]  ;;  %v797_v19 = vrot.slane %v2120_v3, 1 }
  0x1f   : > { %1807 = vmatmul.mubr.msk.f32.vlgmr.msra.gmra.mrb[0].mxu0 %vm279_vm1, %v2087_v51  ;;  %1745 = vmatprep.mubr.msk.f32.mxu1 %vm279_vm1, %v2090_v52  ;;  %v2139_v11 = vsel %vm522_vm2, %v544_v0, %v545_v2  ;;  %v2153_v15 = vsel %vm522_vm2, %v917_v9, %v918_v10  ;;  %v798_v21 = vrot.slane %v2123_v7, 1  ;;  %v1156_v23 = vrot.slane %v233_v5, 1 }
  0x20   : > { %1819 = vmatpush3.msra.mxu0 %v1623_v30  ;;  %1809 = vmatprep.mubr.msk.f32.mxu0 %vm279_vm1, %v2094_v55  ;;  %v1157_v24 = vrot.slane %v234_v22, 1 }
  0x21   : > { %1832 = vmatprep.subr.mxu0 %v1632_v58  ;;  %v799_v25 = vsel %vm252_vm0, %v797_v19, %v798_v21 }
  0x22   : > { %1746 = vmatmul.mubr.msk.f32.gmra.mrb[6].mxu1 %vm279_vm1, %v2107_v59 }
  0x23   : > { %1810 = vmatmul.mubr.msk.f32.gmra.mrb[2].mxu0 %vm279_vm1, %v2112_v60  ;;  %1750 = vmatprep.mubr.msk.f32.mxu1 %vm279_vm1, %v2001_v4  ;;  %v525_v4 = vsel %vm522_vm2, %v523_v17, %v524_v16 }
  0x24   : > { %1812 = vmatprep.mubr.msk.f32.mxu0 %vm279_vm1, %v2116_v63 }
  0x26   : > { %1751 = vmatmul.mubr.msk.f32.vlgmr.msra.gmra.mrb[0].mxu1 %vm279_vm1, %v2007_v6 }
  0x27   : > { %1763 = vmatpush3.msra.mxu1 %v1587_v38  ;;  %1813 = vmatmul.mubr.msk.f32.gmra.mrb[4].mxu0 %vm279_vm1, %v2134_v8 }
  0x28   : > { %1753 = vmatprep.mubr.msk.f32.mxu1 %vm279_vm1, %v2014_v12  ;;  %1815 = vmatprep.mubr.msk.f32.mxu0 %vm279_vm1, %v2139_v11 }
  0x29   : > { %1776 = vmatprep.subr.mxu1 %v1596_v13 }
  0x2a   : > { %1754 = vmatmul.mubr.msk.f32.gmra.mrb[2].mxu1 %vm279_vm1, %v2018_v14 }
  0x2b   : > { %1816 = vmatmul.mubr.msk.f32.gmra.mrb[6].mxu0 %vm279_vm1, %v2153_v15  ;;  %1756 = vmatprep.mubr.msk.f32.mxu1 %vm279_vm1, %v2024_v20 }
  0x2c   : > { %1820 = vmatprep.mubr.msk.f32.mxu0 %vm279_vm1, %v2014_v12 }
  0x2e   : > { %1757 = vmatmul.mubr.msk.f32.gmra.mrb[4].mxu1 %vm279_vm1, %v2032_v26 }
  0x2f   : > { %1821 = vmatmul.mubr.msk.f32.vlgmr.msra.gmra.mrb[0].mxu0 %vm279_vm1, %v2018_v14  ;;  %1759 = vmatprep.mubr.msk.f32.mxu1 %vm279_vm1, %v2045_v32 }
  0x30   : > { %1833 = vmatpush3.msra.mxu0 %v1632_v58  ;;  %1823 = vmatprep.mubr.msk.f32.mxu0 %vm279_vm1, %v2024_v20 }
  0x31   : > { %1846 = vmatprep.subr.mxu0 %v1641_v18 }
  0x32   : > { %1760 = vmatmul.mubr.msk.f32.gmra.mrb[6].mxu1 %vm279_vm1, %v2065_v43 }
  0x33   : > { %1824 = vmatmul.mubr.msk.f32.gmra.mrb[2].mxu0 %vm279_vm1, %v2032_v26  ;;  %1764 = vmatprep.mubr.msk.f32.mxu1 %vm279_vm1, %v525_v4 }
  0x34   : > { %1826 = vmatprep.mubr.msk.f32.mxu0 %vm279_vm1, %v2045_v32 }
  0x36   : > { %1765 = vmatmul.mubr.msk.f32.vlgmr.msra.gmra.mrb[0].mxu1 %vm279_vm1, %v2071_v45 }
  0x37   : > { %1777 = vmatpush3.msra.mxu1 %v1596_v13  ;;  %1827 = vmatmul.mubr.msk.f32.gmra.mrb[4].mxu0 %vm279_vm1, %v2065_v43 }
  0x38   : > { %1767 = vmatprep.mubr.msk.f32.mxu1 %vm279_vm1, %v2087_v51  ;;  %1829 = vmatprep.mubr.msk.f32.mxu0 %vm279_vm1, %v2120_v3 }
  0x39   : > { %1860 = vmatprep.subr.mxu1 %v1982_v1 }
  0x3a   : > { %1768 = vmatmul.mubr.msk.f32.gmra.mrb[2].mxu1 %vm279_vm1, %v2094_v55 }
  0x3b   : > { %1830 = vmatmul.mubr.msk.f32.gmra.mrb[6].mxu0 %vm279_vm1, %v233_v5  ;;  %1770 = vmatprep.mubr.msk.f32.mxu1 %vm279_vm1, %v2112_v60 }
  0x3c   : > { %1834 = vmatprep.mubr.msk.f32.mxu0 %vm279_vm1, %v2037_v27 }
  0x3e   : > { %1771 = vmatmul.mubr.msk.f32.gmra.mrb[4].mxu1 %vm279_vm1, %v2116_v63 }
  0x3f   : > { %1835 = vmatmul.mubr.msk.f32.vlgmr.msra.gmra.mrb[0].mxu0 %vm279_vm1, %v2050_v34  ;;  %1773 = vmatprep.mubr.msk.f32.mxu1 %vm279_vm1, %v2134_v8 }
  0x40   : > { %1847 = vmatpush3.msra.mxu0 %v1641_v18  ;;  %1837 = vmatprep.mubr.msk.f32.mxu0 %vm279_vm1, %v2060_v39 }
  0x42   : > { %1774 = vmatmul.mubr.msk.f32.gmra.mrb[6].mxu1 %vm279_vm1, %v2139_v11 }
  0x43   : > { %1838 = vmatmul.mubr.msk.f32.gmra.mrb[2].mxu0 %vm279_vm1, %v2081_v48  ;;  %1778 = vmatprep.mubr.msk.f32.mxu1 %vm279_vm1, %v2007_v6  ;;  %v1158_v6 = vsel %vm252_vm0, %v1156_v23, %v1157_v24 }
  0x44   : > { %1840 = vmatprep.mubr.msk.f32.mxu0 %vm279_vm1, %v2090_v52 }
  0x46   : > { %1779 = vmatmul.mubr.msk.f32.vlgmr.msra.gmra.mrb[0].mxu1 %vm279_vm1, %v2014_v12  ;;  %v1277_v12 = vrot.slane %v234_v22, 2 }
  0x47   : > { %1861 = vmatpush3.msra.mxu1 %v1982_v1  ;;  %1841 = vmatmul.mubr.msk.f32.gmra.mrb[4].mxu0 %vm279_vm1, %v2107_v59  ;;  %v1276_v1 = vrot.slane %v233_v5, 2 }
  0x48   : > { %1781 = vmatprep.mubr.msk.f32.mxu1 %vm279_vm1, %v2018_v14  ;;  %1843 = vmatprep.mubr.msk.f32.mxu0 %vm279_vm1, %v799_v25 }
  0x49   : > { %v1278_v14 = vsel %vm522_vm2, %v1276_v1, %v1277_v12 }
  0x4a   : > { %1782 = vmatmul.mubr.msk.f32.gmra.mrb[2].mxu1 %vm279_vm1, %v2024_v20 }
  0x4b   : > { %1844 = vmatmul.mubr.msk.f32.gmra.mrb[6].mxu0 %vm279_vm1, %v1158_v6  ;;  %1784 = vmatprep.mubr.msk.f32.mxu1 %vm279_vm1, %v2032_v26 }
  0x4c   : > { %1848 = vmatprep.mubr.msk.f32.mxu0 %vm279_vm1, %v2087_v51 }
  0x4e   : > { %1785 = vmatmul.mubr.msk.f32.gmra.mrb[4].mxu1 %vm279_vm1, %v2045_v32 }
  0x4f   : > { %1849 = vmatmul.mubr.msk.f32.vlgmr.msra.gmra.mrb[0].mxu0 %vm279_vm1, %v2094_v55  ;;  %1787 = vmatprep.mubr.msk.f32.mxu1 %vm279_vm1, %v2065_v43 }
  0x50   : > { %1851 = vmatprep.mubr.msk.f32.mxu0 %vm279_vm1, %v2112_v60 }
  0x52   : > { %1788 = vmatmul.mubr.msk.f32.gmra.mrb[6].mxu1 %vm279_vm1, %v2120_v3 }
  0x53   : > { %1852 = vmatmul.mubr.msk.f32.gmra.mrb[2].mxu0 %vm279_vm1, %v2116_v63  ;;  %1798 = vmatprep.mubr.msk.f32.mxu1 %vm279_vm1, %v2081_v48 }
  0x54   : > { %1854 = vmatprep.mubr.msk.f32.mxu0 %vm279_vm1, %v2134_v8 }
  0x56   : > { %1799 = vmatmul.mubr.msk.f32.vlgmr.msra.gmra.mrb[4].mxu1 %vm279_vm1, %v2090_v52 }
  0x57   : > { %1855 = vmatmul.mubr.msk.f32.gmra.mrb[4].mxu0 %vm279_vm1, %v2139_v11  ;;  %1801 = vmatprep.mubr.msk.f32.mxu1 %vm279_vm1, %v2107_v59 }
  0x58   : > { %1857 = vmatprep.mubr.msk.f32.mxu0 %vm279_vm1, %v2153_v15 }
  0x5a   : > { %1802 = vmatmul.mubr.msk.f32.gmra.mrb[6].mxu1 %vm279_vm1, %v799_v25 }
  0x5b   : > { %1858 = vmatmul.mubr.msk.f32.gmra.mrb[6].mxu0 %vm279_vm1, %v1278_v14 }
 0x119   : > { %v1780_v20 = vpop.f32.mrb[0].mxu1 }
 0x11a   : > { %v749_v26 = vpop.f32.mrb[1].mxu1 }
 0x11d   : > { %v1783_v27 = vpop.f32.mrb[2].mxu1 }
 0x11e   : > { %v759_v28 = vpop.f32.mrb[3].mxu1 }
 0x122   : > { %v1850_v29 = vpop.f32.mrb[0].mxu0 }
 0x123   : > { %v1862_v30 = vadd.f32 %v1850_v29, %v1780_v20  ;;  %v1349_v31 = vpop.f32.mrb[1].mxu0 }
 0x124   : > { %v1863_v32 = vadd.f32 %v1349_v31, %v749_v26 }
 0x125   : > { %1397 = vst.msk [vmem:[%s2268_s18 + $0x8] sm:$0xff] %vm279_vm1, %v1862_v30  ;;  %v1405_v33 = vsel %vm279_vm1, %v1862_v30, 0.0  ;;  %v1428_v34 = vmul.f32 %v1862_v30, %v1862_v30 }
 0x126   : > { %1396 = vst.msk [vmem:[%s2268_s18] sm:$0xff] %vm279_vm1, %v1863_v32  ;;  %v1404_v35 = vsel %vm279_vm1, %v1863_v32, 0.0  ;;  %v1427_v36 = vmul.f32 %v1863_v32, %v1863_v32  ;;  %v1853_v37 = vpop.f32.mrb[2].mxu0 }
 0x127   : > { %v1436_v38 = vsel %vm279_vm1, %v1428_v34, 0.0  ;;  %v1406_v39 = vadd.f32 %v1405_v33, %v1404_v35  ;;  %v1864_v40 = vadd.f32 %v1853_v37, %v1783_v27  ;;  %v1359_v41 = vpop.f32.mrb[3].mxu0 }
 0x128   : > { %v1435_v42 = vsel %vm279_vm1, %v1427_v36, 0.0  ;;  %v1865_v43 = vadd.f32 %v1359_v41, %v759_v28 }
 0x129   : > { %v1437_v44 = vadd.f32 %v1436_v38, %v1435_v42  ;;  %1399 = vst.msk [vmem:[%s2268_s18 + $0x18] sm:$0xff] %vm279_vm1, %v1864_v40  ;;  %v1800_v45 = vpop.f32.mrb[4].mxu1  ;;  %v1430_v46 = vmul.f32 %v1864_v40, %v1864_v40  ;;  %v1409_v54 = vsel %vm279_vm1, %v1864_v40, 0.0 }
 0x12a   : > { %1398 = vst.msk [vmem:[%s2268_s18 + $0x10] sm:$0xff] %vm279_vm1, %v1865_v43  ;;  %v1407_v47 = vsel %vm279_vm1, %v1865_v43, 0.0  ;;  %v1429_v48 = vmul.f32 %v1865_v43, %v1865_v43  ;;  %v1856_v49 = vpop.f32.mrb[4].mxu0  ;;  %v890_v50 = vpop.f32.mrb[5].mxu1 }
 0x12b   : > { %v1408_v51 = vadd.f32 %v1407_v47, %v1406_v39  ;;  %v1866_v52 = vadd.f32 %v1856_v49, %v1800_v45  ;;  %v1369_v53 = vpop.f32.mrb[5].mxu0  ;;  %v1440_v60 = vsel %vm279_vm1, %v1430_v46, 0.0 }
 0x12c   : > { %v1438_v55 = vsel %vm279_vm1, %v1429_v48, 0.0  ;;  %v1867_v56 = vadd.f32 %v1369_v53, %v890_v50 }
 0x12d   : > { %v1439_v57 = vadd.f32 %v1438_v55, %v1437_v44  ;;  %1401 = vst.msk [vmem:[%s2268_s18 + $0x28] sm:$0xff] %vm279_vm1, %v1866_v52  ;;  %v1410_v58 = vadd.f32 %v1409_v54, %v1408_v51  ;;  %v1803_v59 = vpop.f32.mrb[6].mxu1  ;;  %v1432_v61 = vmul.f32 %v1866_v52, %v1866_v52  ;;  %v1413_v10 = vsel %vm279_vm1, %v1866_v52, 0.0 }
 0x12e   : > { %1400 = vst.msk [vmem:[%s2268_s18 + $0x20] sm:$0xff] %vm279_vm1, %v1867_v56  ;;  %v1411_v62 = vsel %vm279_vm1, %v1867_v56, 0.0  ;;  %v1431_v63 = vmul.f32 %v1867_v56, %v1867_v56  ;;  %v1859_v0 = vpop.f32.mrb[6].mxu0  ;;  %v900_v2 = vpop.f32.mrb[7].mxu1 }
 0x12f   : > { %v1412_v3 = vadd.f32 %v1411_v62, %v1410_v58  ;;  %v1441_v7 = vadd.f32 %v1440_v60, %v1439_v57  ;;  %v1868_v8 = vadd.f32 %v1859_v0, %v1803_v59  ;;  %v1379_v9 = vpop.f32.mrb[7].mxu0  ;;  %v1444_v17 = vsel %vm279_vm1, %v1432_v61, 0.0 }
 0x130   : > { %v1442_v11 = vsel %vm279_vm1, %v1431_v63, 0.0  ;;  %v1869_v13 = vadd.f32 %v1379_v9, %v900_v2 }
 0x131   : > { %v1443_v15 = vadd.f32 %v1442_v11, %v1441_v7  ;;  %1403 = vst.msk [vmem:[%s2268_s18 + $0x38] sm:$0xff] %vm279_vm1, %v1868_v8  ;;  %v1414_v16 = vadd.f32 %v1413_v10, %v1412_v3  ;;  %v1434_v18 = vmul.f32 %v1868_v8, %v1868_v8  ;;  %v1417_v22 = vsel %vm279_vm1, %v1868_v8, 0.0 }
 0x132   : > { %1402 = vst.msk [vmem:[%s2268_s18 + $0x30] sm:$0xff] %vm279_vm1, %v1869_v13  ;;  %v1415_v4 = vsel %vm279_vm1, %v1869_v13, 0.0  ;;  %v1433_v5 = vmul.f32 %v1869_v13, %v1869_v13 }
 0x133   : > { %v1416_v19 = vadd.f32 %v1415_v4, %v1414_v16  ;;  %v1445_v21 = vadd.f32 %v1444_v17, %v1443_v15  ;;  %v1448_v6 = vsel %vm279_vm1, %v1434_v18, 0.0 }
 0x134   : > { %v1446_v23 = vsel %vm279_vm1, %v1433_v5, 0.0 }
 0x135   : > { %v1418_v24 = vadd.f32 %v1417_v22, %v1416_v19  ;;  %v1447_v25 = vadd.f32 %v1446_v23, %v1445_v21 }
 0x137   : > { %v1419_v1 = vrot.slane %v1418_v24, 4  ;;  %v1449_v12 = vadd.f32 %v1448_v6, %v1447_v25 }
 0x139   : > { %v1420_v14 = vadd.f32 %v1419_v1, %v1418_v24  ;;  %v1450_v20 = vrot.slane %v1449_v12, 4 }
 0x13b   : > { %v1421_v26 = vrot.slane %v1420_v14, 2  ;;  %v1451_v27 = vadd.f32 %v1450_v20, %v1449_v12 }
 0x13d   : > { %v1422_v28 = vadd.f32 %v1421_v26, %v1420_v14  ;;  %v1452_v29 = vrot.slane %v1451_v27, 2 }
 0x13f   : > { %v1423_v30 = vrot.slane %v1422_v28, 1  ;;  %v1453_v31 = vadd.f32 %v1452_v29, %v1451_v27 }
 0x141   : > { %v1424_v32 = vadd.f32 %v1423_v30, %v1422_v28  ;;  %v1454_v33 = vrot.slane %v1453_v31, 1 }
 0x143   : > { %1426 = vst.msk [vmem:[%s211_s21] sm:$0x1] %vm1425_vm3, %v1424_v32  ;;  %v1455_v34 = vadd.f32 %v1454_v33, %v1453_v31 }
 0x145   : > { %1456 = vst.msk [vmem:[%s214_s24] sm:$0x1] %vm1425_vm3, %v1455_v34 }
 0x146 PF: > { %s15_s15 = sadd.s32 1, %s1941_s15  }
 0x147   : > { %p12_p4 = scmp.ge.s32.totalorder %s15_s15, 4  }
 0x149   :  { %14 = sbr.rel (!%p12_p4) target bundleno = 1 (0x1), region = 90 }

// kernel: residual_block.9
= control target key start
LH: loop header
LB: loop body
LE: loop exit
PB: predicated region body
PF: predicated region fallthrough
CT: control target
= control target key end

     0   :  { %s511_s21 = smov 0   ;;  %s606_s0 = inlined_call_operand.vmem [shape: f32[2,64,8], index: 0, kind: input, shape index: {}]   ;;  %s607_s1 = inlined_call_operand.vmem [shape: f32[1,8], index: 1, kind: input, shape index: {}]   ;;  %s608_s2 = inlined_call_operand.vmem [shape: f32[1,8], index: 2, kind: input, shape index: {}]   ;;  %s609_s3 = inlined_call_operand.vmem [shape: f32[2,64,8], index: 3, kind: input, shape index: {}]   ;;  %s610_s4 = inlined_call_operand.vmem [shape: f32[1,8], index: 4, kind: input, shape index: {}]   ;;  %s611_s5 = inlined_call_operand.vmem [shape: f32[1,8], index: 5, kind: input, shape index: {}]   ;;  %s612_s6 = inlined_call_operand.vmem [shape: f32[2,64,8], index: 6, kind: output, shape index: {}]  }
   0x1 LB: > { %s440_s22 = sadd.s32 4294967295, %s474_s21   ;;  %p444_p0 = scmp.ge.s32.totalorder %s474_s21, 1  ;;  %s474_s21 = sphi %s511_s21, %s16_s21  }
   0x2   : > { %p222_p1 = scmp.lt.s32.totalorder %s474_s21, 3 }
   0x4   : > { %p223_p2 = pnand %p444_p0, %p222_p1 }
   0x5   : > { %p257_p3 = scmp.lt.s32.totalorder (!%p223_p2), %s440_s22, 1  ;;  %v451_v0 = vld [vmem:[%s607_s1] ss:$0 sm:$0xff] (!%p223_p2)  ;;  %vm364_vm0 = vcmask (!%p223_p2), 64512  }
   0x6   : > { %226 = sbr.rel (%p223_p2) target bundleno = 35 (0x23), region = 44  ;;  %v453_v1 = vld [vmem:[%s610_s4] ss:$0 sm:$0xff] (!%p223_p2) }
   0x7   : > { %v542_v2 = vld [vmem:[%s608_s2] ss:$0 sm:$0xff] (!%p223_p2) }
   0x8   : > { %v547_v3 = vld [vmem:[%s611_s5] ss:$0 sm:$0xff] (!%p223_p2) }
   0xd   : > { %s614_s22 = smov (!%p257_p3, %s440_s22), 1 }
   0xe   : > { %s519_s23 = sshll.u32 %s614_s22, 6 }
   0xf   : > { %s531_s30 = scalar_lea.vmem %s606_s0, %s519_s23  ;;  %s537_s9 = scalar_lea.vmem %s609_s3, %s519_s23 }
  0x10   : > { %v272_v4 = vld [vmem:[%s531_s30] sm:$0xff]  ;;  %v273_v6 = vld [vmem:[%s531_s30 + $0x8] sm:$0xff]  ;;  %v274_v11 = vld [vmem:[%s531_s30 + $0x10] sm:$0xff]  ;;  %s572_s16 = scalar_lea.vmem %s612_s6, %s519_s23 }
  0x11   : > { %v310_v5 = vld [vmem:[%s537_s9] sm:$0xff]  ;;  %v287_v7 = vmul.f32 %v451_v0, %v272_v4  ;;  %v288_v9 = vmul.f32 %v451_v0, %v273_v6  ;;  %v311_v10 = vld [vmem:[%s537_s9 + $0x8] sm:$0xff]  ;;  %v312_v12 = vld [vmem:[%s537_s9 + $0x10] sm:$0xff]  ;;  %v289_v14 = vmul.f32 %v451_v0, %v274_v11 }
  0x12   : > { %v325_v8 = vmul.f32 %v453_v1, %v310_v5  ;;  %v326_v13 = vmul.f32 %v453_v1, %v311_v10  ;;  %v327_v15 = vmul.f32 %v453_v1, %v312_v12  ;;  %v275_v16 = vld [vmem:[%s531_s30 + $0x18] sm:$0xff]  ;;  %v276_v18 = vld [vmem:[%s531_s30 + $0x20] sm:$0xff]  ;;  %v277_v24 = vld [vmem:[%s531_s30 + $0x28] sm:$0xff] }
  0x13   : > { %v313_v17 = vld [vmem:[%s537_s9 + $0x18] sm:$0xff]  ;;  %v302_v19 = vadd.f32 %v542_v2, %v287_v7  ;;  %v303_v21 = vadd.f32 %v542_v2, %v288_v9  ;;  %v290_v22 = vmul.f32 %v451_v0, %v275_v16  ;;  %v314_v23 = vld [vmem:[%s537_s9 + $0x20] sm:$0xff]  ;;  %v304_v26 = vadd.f32 %v542_v2, %v289_v14  ;;  %v315_v29 = vld [vmem:[%s537_s9 + $0x28] sm:$0xff] }
  0x14   : > { %v340_v20 = vadd.f32 %v547_v3, %v325_v8  ;;  %v341_v25 = vadd.f32 %v547_v3, %v326_v13  ;;  %v342_v27 = vadd.f32 %v547_v3, %v327_v15  ;;  %v328_v28 = vmul.f32 %v453_v1, %v313_v17  ;;  %v278_v38 = vld [vmem:[%s531_s30 + $0x30] sm:$0xff]  ;;  %v279_v44 = vld [vmem:[%s531_s30 + $0x38] sm:$0xff] }
  0x15   : > { %v305_v31 = vadd.f32 %v542_v2, %v290_v22  ;;  %v291_v32 = vmul.f32 %v451_v0, %v276_v18  ;;  %v329_v33 = vmul.f32 %v453_v1, %v314_v23  ;;  %v292_v37 = vmul.f32 %v451_v0, %v277_v24  ;;  %v316_v39 = vld [vmem:[%s537_s9 + $0x30] sm:$0xff]  ;;  %v317_v45 = vld [vmem:[%s537_s9 + $0x38] sm:$0xff] }
  0x16   : > { %v348_v30 = vadd.f32 %v340_v20, %v302_v19  ;;  %v349_v34 = vadd.f32 %v341_v25, %v303_v21  ;;  %v350_v35 = vadd.f32 %v342_v27, %v304_v26  ;;  %v343_v36 = vadd.f32 %v547_v3, %v328_v28 }
  0x17   : > { %v306_v41 = vadd.f32 %v542_v2, %v291_v32  ;;  %v344_v42 = vadd.f32 %v547_v3, %v329_v33  ;;  %v330_v43 = vmul.f32 %v453_v1, %v315_v29  ;;  %v307_v49 = vadd.f32 %v542_v2, %v292_v37 }
  0x18   : > { %v356_v40 = vmax.f32 %v348_v30, 0.0  ;;  %v357_v46 = vmax.f32 %v349_v34, 0.0  ;;  %v358_v47 = vmax.f32 %v350_v35, 0.0  ;;  %v351_v48 = vadd.f32 %v343_v36, %v305_v31 }
  0x19   : > { %v352_v50 = vadd.f32 %v344_v42, %v306_v41  ;;  %v345_v51 = vadd.f32 %v547_v3, %v330_v43  ;;  %v293_v52 = vmul.f32 %v451_v0, %v278_v38  ;;  %v331_v53 = vmul.f32 %v453_v1, %v316_v39 }
  0x1a   : > { %365 = vst.msk [vmem:[%s572_s16] sm:$0xff] %vm364_vm0, %v356_v40  ;;  %366 = vst.msk [vmem:[%s572_s16 + $0x8] sm:$0xff] %vm364_vm0, %v357_v46  ;;  %v359_v54 = vmax.f32 %v351_v48, 0.0  ;;  %v294_v55 = vmul.f32 %v451_v0, %v279_v44  ;;  %v332_v56 = vmul.f32 %v453_v1, %v317_v45 }
  0x1b   : > { %367 = vst.msk [vmem:[%s572_s16 + $0x10] sm:$0xff] %vm364_vm0, %v358_v47  ;;  %v360_v57 = vmax.f32 %v352_v50, 0.0  ;;  %v353_v58 = vadd.f32 %v345_v51, %v307_v49  ;;  %v308_v59 = vadd.f32 %v542_v2, %v293_v52  ;;  %v346_v60 = vadd.f32 %v547_v3, %v331_v53 }
  0x1c   : > { %368 = vst.msk [vmem:[%s572_s16 + $0x18] sm:$0xff] %vm364_vm0, %v359_v54  ;;  %v309_v61 = vadd.f32 %v542_v2, %v294_v55  ;;  %v347_v62 = vadd.f32 %v547_v3, %v332_v56 }
  0x1d   : > { %369 = vst.msk [vmem:[%s572_s16 + $0x20] sm:$0xff] %vm364_vm0, %v360_v57  ;;  %v361_v63 = vmax.f32 %v353_v58, 0.0  ;;  %v354_v4 = vadd.f32 %v346_v60, %v308_v59 }
  0x1e   : > { %v355_v0 = vadd.f32 %v347_v62, %v309_v61 }
  0x1f   : > { %370 = vst.msk [vmem:[%s572_s16 + $0x28] sm:$0xff] %vm364_vm0, %v361_v63  ;;  %v362_v1 = vmax.f32 %v354_v4, 0.0 }
  0x20   : > { %v363_v5 = vmax.f32 %v355_v0, 0.0 }
  0x21   : > { %371 = vst.msk [vmem:[%s572_s16 + $0x30] sm:$0xff] %vm364_vm0, %v362_v1 }
  0x22   : > { %372 = vst.msk [vmem:[%s572_s16 + $0x38] sm:$0xff] %vm364_vm0, %v363_v5 }
  0x23 PF: > { %s16_s21 = sadd.s32 1, %s474_s21  }
  0x24   : > { %p13_p4 = scmp.ge.s32.totalorder %s16_s21, 4  }
  0x26   :  { %15 = sbr.rel (!%p13_p4) target bundleno = 1 (0x1), region = 77 }

</bundles_post_ra>
